<compile_context>
chip_gen: v7x
topology: tpu7x:2x2x1
jax: 0.10.0
libtpu: 0.0.40
codegen_flags: <defaults>
</compile_context>

<pallas_src>
import jax
import jax.numpy as jnp
from jax.experimental import pallas as pl

# ----------------------------- model hyper-params -----------------------------
B = 2          # batch
C = 4          # image channels
IMG = 16       # image spatial size
PATCH = 8      # patch size
NPATCH = (IMG // PATCH) ** 2          # 4 image tokens
S_TXT = 8      # text sequence length
S_ALL = S_TXT + NPATCH                # 12 multimodal tokens
HID = 32       # hidden size
NHEAD = 4
DHEAD = HID // NHEAD                  # 8
MLP = 64
VOCAB = 64
NTYPE = 2
EPS = 1e-5
PATCH_DIM = C * PATCH * PATCH         # 256


# ------------------------------ fused Pallas kernel ----------------------------
def _fused_encoder_kernel(
    ids_ref, tt_ref, bias_ref, patch_ref,
    wemb_ref, temb_ref, tpos_ref, tlng_ref, tlnb_ref,
    pw_ref, pb_ref, ipos_ref, ilng_ref, ilnb_ref,
    wqkv_ref, bqkv_ref, wo_ref, bo_ref,
    ln1g_ref, ln1b_ref, w1_ref, b1_ref, w2_ref, b2_ref,
    ln2g_ref, ln2b_ref,
    out_ref,
):
    f32 = jnp.float32

    def layernorm(x, g, b):
        mu = jnp.mean(x, axis=-1, keepdims=True)
        var = jnp.mean(jnp.square(x - mu), axis=-1, keepdims=True)
        return (x - mu) * jax.lax.rsqrt(var + EPS) * g + b

    # ---- text embeddings: vocab gather as one-hot MXU matmul + type select ----
    ids = ids_ref[...]                                              # (B*S_TXT, 1) i32
    vocab_iota = jax.lax.broadcasted_iota(jnp.int32, (B * S_TXT, VOCAB), 1)
    onehot = (ids == vocab_iota).astype(f32)                        # (16, 64)
    t = jnp.dot(onehot, wemb_ref[...], preferred_element_type=f32)  # (16, 32)
    temb = temb_ref[...]                                            # (NTYPE, HID); NTYPE == 2
    t = t + jnp.where(tt_ref[...] == 0, temb[0:1, :], temb[1:2, :])
    t = t + jnp.concatenate([tpos_ref[...]] * B, axis=0)            # tiled positional emb
    t = layernorm(t, tlng_ref[...], tlnb_ref[...])

    # ---- patch embeddings (patchify done in wrapper; GEMM here) ----
    pe = jnp.dot(patch_ref[...], pw_ref[...], preferred_element_type=f32) + pb_ref[...]
    pe = pe + jnp.concatenate([ipos_ref[...]] * B, axis=0)
    pe = layernorm(pe, ilng_ref[...], ilnb_ref[...])

    # ---- interleave text / image tokens per batch -> flat (B*S_ALL, HID) slab ----
    parts = []
    for b in range(B):
        parts.append(t[b * S_TXT:(b + 1) * S_TXT, :])
        parts.append(pe[b * NPATCH:(b + 1) * NPATCH, :])
    xf = jnp.concatenate(parts, axis=0)                             # (24, 32)

    # ---- fused QKV projection: one GEMM for Q, K and V ----
    qkv = jnp.dot(xf, wqkv_ref[...], preferred_element_type=f32) + bqkv_ref[...]   # (24, 96)
    qkv3 = jnp.stack(
        [qkv[b * S_ALL:(b + 1) * S_ALL, :] for b in range(B)], axis=0)              # (B, S, 3H)

    bias = bias_ref[...]                                            # (B, 1, S_ALL) additive mask
    scale = 1.0 / (DHEAD ** 0.5)

    head_outs = []
    for h in range(NHEAD):                                          # static unroll over heads
        q = qkv3[:, :, h * DHEAD:(h + 1) * DHEAD]                   # (B, S, Dh)
        k = qkv3[:, :, HID + h * DHEAD:HID + (h + 1) * DHEAD]
        v = qkv3[:, :, 2 * HID + h * DHEAD:2 * HID + (h + 1) * DHEAD]
        s = jnp.einsum("bqd,bkd->bqk", q, k, preferred_element_type=f32) * scale
        s = s + bias
        m = jnp.max(s, axis=-1, keepdims=True)
        p = jnp.exp(s - m)
        denom = jnp.sum(p, axis=-1, keepdims=True)
        o = jnp.einsum("bqk,bkd->bqd", p, v, preferred_element_type=f32)
        head_outs.append(o * pl.reciprocal(denom, approx=True))     # EUP reciprocal, not VALU div
    attn3 = jnp.concatenate(head_outs, axis=-1)                     # (B, S, HID)
    attn = jnp.concatenate([attn3[b] for b in range(B)], axis=0)    # (24, 32)

    attn = jnp.dot(attn, wo_ref[...], preferred_element_type=f32) + bo_ref[...]

    x1 = layernorm(xf + attn, ln1g_ref[...], ln1b_ref[...])
    h1 = jnp.dot(x1, w1_ref[...], preferred_element_type=f32) + b1_ref[...]
    # TODO(synk): PyTorch nn.GELU defaults to exact erf; tanh approximation is used here.
    h1 = jax.nn.gelu(h1)
    h2 = jnp.dot(h1, w2_ref[...], preferred_element_type=f32) + b2_ref[...]
    x2 = layernorm(x1 + h2, ln2g_ref[...], ln2b_ref[...])

    out_ref[...] = x2                                               # (B*S_ALL, HID)


# ------------------------------ parameter init --------------------------------
def init_params(key):
    ks = jax.random.split(key, 16)
    sd = 0.02

    def nrm(k, shape):
        return sd * jax.random.normal(k, shape, dtype=jnp.float32)

    return {
        "word_emb": nrm(ks[0], (VOCAB, HID)),
        "type_emb": nrm(ks[1], (NTYPE, HID)),
        "txt_pos_emb": nrm(ks[2], (S_TXT, HID)),
        "txt_ln_g": jnp.ones((HID,), jnp.float32),
        "txt_ln_b": jnp.zeros((HID,), jnp.float32),
        "patch_w": nrm(ks[3], (PATCH_DIM, HID)),
        "patch_b": jnp.zeros((HID,), jnp.float32),
        "img_pos_emb": nrm(ks[4], (NPATCH, HID)),
        "img_ln_g": jnp.ones((HID,), jnp.float32),
        "img_ln_b": jnp.zeros((HID,), jnp.float32),
        "wqkv": nrm(ks[5], (HID, 3 * HID)),          # fused Q|K|V weight
        "bqkv": jnp.zeros((3 * HID,), jnp.float32),
        "wo": nrm(ks[6], (HID, HID)), "bo": jnp.zeros((HID,), jnp.float32),
        "ln1_g": jnp.ones((HID,), jnp.float32), "ln1_b": jnp.zeros((HID,), jnp.float32),
        "w1": nrm(ks[7], (HID, MLP)), "b1": jnp.zeros((MLP,), jnp.float32),
        "w2": nrm(ks[8], (MLP, HID)), "b2": jnp.zeros((HID,), jnp.float32),
        "ln2_g": jnp.ones((HID,), jnp.float32), "ln2_b": jnp.zeros((HID,), jnp.float32),
    }


# --------------------------------- forward ------------------------------------
def multimodal_encoder_forward(params, input_ids, token_type_ids, attention_mask,
                               pixel_values):
    bsz = input_ids.shape[0]

    # Patchify: NCHW conv with stride == kernel  ==  reshape/transpose + matmul.
    # (Wrapper-side layout plumbing only; the GEMM happens inside the fused kernel.)
    p = pixel_values.reshape(bsz, C, IMG // PATCH, PATCH, IMG // PATCH, PATCH)
    patches = p.transpose(0, 2, 4, 1, 3, 5).reshape(bsz * NPATCH, PATCH_DIM)

    # Additive attention-mask bias over all keys (text keys masked, image keys open).
    full_mask = jnp.concatenate(
        [attention_mask.astype(jnp.float32), jnp.ones((bsz, NPATCH), jnp.float32)],
        axis=1)
    bias = ((1.0 - full_mask) * (-1e9)).reshape(bsz, 1, S_ALL)

    ids = input_ids.reshape(bsz * S_TXT, 1).astype(jnp.int32)
    tt = token_type_ids.reshape(bsz * S_TXT, 1).astype(jnp.int32)

    args = (
        ids, tt, bias, patches,
        params["word_emb"], params["type_emb"], params["txt_pos_emb"],
        params["txt_ln_g"].reshape(1, HID), params["txt_ln_b"].reshape(1, HID),
        params["patch_w"], params["patch_b"].reshape(1, HID),
        params["img_pos_emb"],
        params["img_ln_g"].reshape(1, HID), params["img_ln_b"].reshape(1, HID),
        params["wqkv"], params["bqkv"].reshape(1, 3 * HID),
        params["wo"], params["bo"].reshape(1, HID),
        params["ln1_g"].reshape(1, HID), params["ln1_b"].reshape(1, HID),
        params["w1"], params["b1"].reshape(1, MLP),
        params["w2"], params["b2"].reshape(1, HID),
        params["ln2_g"].reshape(1, HID), params["ln2_b"].reshape(1, HID),
    )

    # Single fused pallas_call: no grid, full-array VMEM-resident operands,
    # one HBM write of the final slab.
    out_flat = pl.pallas_call(
        _fused_encoder_kernel,
        out_shape=jax.ShapeDtypeStruct((bsz * S_ALL, HID), jnp.float32),
    )(*args)

    return out_flat.reshape(bsz, S_ALL, HID)      # multimodal_embeddings


# ----------------------------------- main --------------------------------------
if __name__ == "__main__":
    key = jax.random.PRNGKey(0)
    kp, k1, k2, k3 = jax.random.split(key, 4)

    params = init_params(kp)

    input_ids = jax.random.randint(k1, (B, S_TXT), 0, VOCAB, dtype=jnp.int32)
    token_type_ids = jax.random.randint(k2, (B, S_TXT), 0, NTYPE, dtype=jnp.int32)
    attention_mask = jnp.ones((B, S_TXT), jnp.int32).at[1, S_TXT - 2:].set(0)
    pixel_values = jax.random.normal(k3, (B, C, IMG, IMG), dtype=jnp.float32)

    fwd = jax.jit(multimodal_encoder_forward)
    out = fwd(params, input_ids, token_type_ids, attention_mask, pixel_values)
    out = jax.block_until_ready(out)

    assert out.shape == (B, S_ALL, HID)
    assert bool(jnp.all(jnp.isfinite(out)))
    print("KERNEL_OK")
</pallas_src>

<mosaic_0001>
module attributes {stable_mosaic.version = 11 : i64} {
  func.func @_fused_encoder_kernel(%arg0: memref<16x1xi32, #tpu.memory_space<vmem>>, %arg1: memref<16x1xi32, #tpu.memory_space<vmem>>, %arg2: memref<2x1x12xf32, #tpu.memory_space<vmem>>, %arg3: memref<8x256xf32, #tpu.memory_space<vmem>>, %arg4: memref<64x32xf32, #tpu.memory_space<vmem>>, %arg5: memref<2x32xf32, #tpu.memory_space<vmem>>, %arg6: memref<8x32xf32, #tpu.memory_space<vmem>>, %arg7: memref<1x32xf32, #tpu.memory_space<vmem>>, %arg8: memref<1x32xf32, #tpu.memory_space<vmem>>, %arg9: memref<256x32xf32, #tpu.memory_space<vmem>>, %arg10: memref<1x32xf32, #tpu.memory_space<vmem>>, %arg11: memref<4x32xf32, #tpu.memory_space<vmem>>, %arg12: memref<1x32xf32, #tpu.memory_space<vmem>>, %arg13: memref<1x32xf32, #tpu.memory_space<vmem>>, %arg14: memref<32x96xf32, #tpu.memory_space<vmem>>, %arg15: memref<1x96xf32, #tpu.memory_space<vmem>>, %arg16: memref<32x32xf32, #tpu.memory_space<vmem>>, %arg17: memref<1x32xf32, #tpu.memory_space<vmem>>, %arg18: memref<1x32xf32, #tpu.memory_space<vmem>>, %arg19: memref<1x32xf32, #tpu.memory_space<vmem>>, %arg20: memref<32x64xf32, #tpu.memory_space<vmem>>, %arg21: memref<1x64xf32, #tpu.memory_space<vmem>>, %arg22: memref<64x32xf32, #tpu.memory_space<vmem>>, %arg23: memref<1x32xf32, #tpu.memory_space<vmem>>, %arg24: memref<1x32xf32, #tpu.memory_space<vmem>>, %arg25: memref<1x32xf32, #tpu.memory_space<vmem>>, %arg26: memref<24x32xf32, #tpu.memory_space<vmem>>) attributes {dimension_semantics = [], scalar_prefetch = 0 : i64, scratch_operands = 0 : i64, tpu.core_type = #tpu.core_type<tc>} {
    %c0 = arith.constant 0 : index
    %c0_0 = arith.constant 0 : index
    %0 = vector.load %arg0[%c0, %c0_0] : memref<16x1xi32, #tpu.memory_space<vmem>>, vector<16x1xi32>
    %1 = tpu.iota {dimensions = array<i32: 1>} : vector<16x64xi32>
    %2 = vector.broadcast %0 : vector<16x1xi32> to vector<16x64xi32>
    %3 = arith.cmpi eq, %2, %1 : vector<16x64xi32>
    %4 = arith.extui %3 : vector<16x64xi1> to vector<16x64xi32>
    %5 = arith.sitofp %4 : vector<16x64xi32> to vector<16x64xf32>
    %c0_1 = arith.constant 0 : index
    %c0_2 = arith.constant 0 : index
    %6 = vector.load %arg4[%c0_1, %c0_2] : memref<64x32xf32, #tpu.memory_space<vmem>>, vector<64x32xf32>
    %cst = arith.constant dense<0.000000e+00> : vector<16x32xf32>
    %7 = tpu.matmul %5, %6, %cst {dimension_numbers = #tpu.dot_dimension_numbers<[1], [0], [0], [1], [0, 0, 1, 1], [], []>} : vector<16x64xf32>, vector<64x32xf32>, vector<16x32xf32> -> vector<16x32xf32>
    %c0_3 = arith.constant 0 : index
    %c0_4 = arith.constant 0 : index
    %8 = vector.load %arg5[%c0_3, %c0_4] : memref<2x32xf32, #tpu.memory_space<vmem>>, vector<2x32xf32>
    %c0_5 = arith.constant 0 : index
    %c0_6 = arith.constant 0 : index
    %9 = vector.load %arg1[%c0_5, %c0_6] : memref<16x1xi32, #tpu.memory_space<vmem>>, vector<16x1xi32>
    %c0_i32 = arith.constant 0 : i32
    %10 = vector.broadcast %c0_i32 : i32 to vector<16x1xi32>
    %11 = arith.cmpi eq, %9, %10 : vector<16x1xi32>
    %12 = vector.extract_strided_slice %8 {offsets = [0, 0], sizes = [1, 32], strides = [1, 1]} : vector<2x32xf32> to vector<1x32xf32>
    %13 = vector.extract_strided_slice %8 {offsets = [1, 0], sizes = [1, 32], strides = [1, 1]} : vector<2x32xf32> to vector<1x32xf32>
    %14 = vector.shape_cast %11 : vector<16x1xi1> to vector<16x1xi1>
    %15 = vector.broadcast %14 : vector<16x1xi1> to vector<16x32xi1>
    %16 = vector.shape_cast %12 : vector<1x32xf32> to vector<1x32xf32>
    %17 = vector.broadcast %16 : vector<1x32xf32> to vector<16x32xf32>
    %18 = vector.shape_cast %13 : vector<1x32xf32> to vector<1x32xf32>
    %19 = vector.broadcast %18 : vector<1x32xf32> to vector<16x32xf32>
    %20 = arith.select %15, %17, %19 : vector<16x32xi1>, vector<16x32xf32>
    %21 = arith.addf %7, %20 : vector<16x32xf32>
    %c0_7 = arith.constant 0 : index
    %c0_8 = arith.constant 0 : index
    %22 = vector.load %arg6[%c0_7, %c0_8] : memref<8x32xf32, #tpu.memory_space<vmem>>, vector<8x32xf32>
    %23 = tpu.concatenate %22, %22 in 0 : vector<8x32xf32>, vector<8x32xf32> -> vector<16x32xf32>
    %24 = arith.addf %21, %23 : vector<16x32xf32>
    %c0_9 = arith.constant 0 : index
    %c0_10 = arith.constant 0 : index
    %25 = vector.load %arg7[%c0_9, %c0_10] : memref<1x32xf32, #tpu.memory_space<vmem>>, vector<1x32xf32>
    %c0_11 = arith.constant 0 : index
    %c0_12 = arith.constant 0 : index
    %26 = vector.load %arg8[%c0_11, %c0_12] : memref<1x32xf32, #tpu.memory_space<vmem>>, vector<1x32xf32>
    %cst_13 = arith.constant dense<0.000000e+00> : vector<16xf32>
    %27 = vector.multi_reduction <add>, %24, %cst_13 [1] : vector<16x32xf32> to vector<16xf32>
    %28 = vector.shape_cast %27 : vector<16xf32> to vector<16x1xf32>
    %cst_14 = arith.constant 3.200000e+01 : f32
    %29 = vector.broadcast %cst_14 : f32 to vector<16x1xf32>
    %30 = arith.divf %28, %29 : vector<16x1xf32>
    %31 = vector.broadcast %30 : vector<16x1xf32> to vector<16x32xf32>
    %32 = arith.subf %24, %31 : vector<16x32xf32>
    %33 = arith.mulf %32, %32 : vector<16x32xf32>
    %cst_15 = arith.constant dense<0.000000e+00> : vector<16xf32>
    %34 = vector.multi_reduction <add>, %33, %cst_15 [1] : vector<16x32xf32> to vector<16xf32>
    %35 = vector.shape_cast %34 : vector<16xf32> to vector<16x1xf32>
    %cst_16 = arith.constant 3.200000e+01 : f32
    %36 = vector.broadcast %cst_16 : f32 to vector<16x1xf32>
    %37 = arith.divf %35, %36 : vector<16x1xf32>
    %38 = vector.broadcast %30 : vector<16x1xf32> to vector<16x32xf32>
    %39 = arith.subf %24, %38 : vector<16x32xf32>
    %cst_17 = arith.constant 9.99999974E-6 : f32
    %40 = vector.broadcast %cst_17 : f32 to vector<16x1xf32>
    %41 = arith.addf %37, %40 : vector<16x1xf32>
    %42 = math.rsqrt %41 : vector<16x1xf32>
    %43 = vector.broadcast %42 : vector<16x1xf32> to vector<16x32xf32>
    %44 = arith.mulf %39, %43 : vector<16x32xf32>
    %45 = vector.broadcast %25 : vector<1x32xf32> to vector<16x32xf32>
    %46 = arith.mulf %44, %45 : vector<16x32xf32>
    %47 = vector.broadcast %26 : vector<1x32xf32> to vector<16x32xf32>
    %48 = arith.addf %46, %47 : vector<16x32xf32>
    %c0_18 = arith.constant 0 : index
    %c0_19 = arith.constant 0 : index
    %49 = vector.load %arg3[%c0_18, %c0_19] : memref<8x256xf32, #tpu.memory_space<vmem>>, vector<8x256xf32>
    %c0_20 = arith.constant 0 : index
    %c0_21 = arith.constant 0 : index
    %50 = vector.load %arg9[%c0_20, %c0_21] : memref<256x32xf32, #tpu.memory_space<vmem>>, vector<256x32xf32>
    %cst_22 = arith.constant dense<0.000000e+00> : vector<8x32xf32>
    %51 = tpu.matmul %49, %50, %cst_22 {dimension_numbers = #tpu.dot_dimension_numbers<[1], [0], [0], [1], [0, 0, 1, 1], [], []>} : vector<8x256xf32>, vector<256x32xf32>, vector<8x32xf32> -> vector<8x32xf32>
    %c0_23 = arith.constant 0 : index
    %c0_24 = arith.constant 0 : index
    %52 = vector.load %arg10[%c0_23, %c0_24] : memref<1x32xf32, #tpu.memory_space<vmem>>, vector<1x32xf32>
    %53 = vector.broadcast %52 : vector<1x32xf32> to vector<8x32xf32>
    %54 = arith.addf %51, %53 : vector<8x32xf32>
    %c0_25 = arith.constant 0 : index
    %c0_26 = arith.constant 0 : index
    %55 = vector.load %arg11[%c0_25, %c0_26] : memref<4x32xf32, #tpu.memory_space<vmem>>, vector<4x32xf32>
    %56 = tpu.concatenate %55, %55 in 0 : vector<4x32xf32>, vector<4x32xf32> -> vector<8x32xf32>
    %57 = arith.addf %54, %56 : vector<8x32xf32>
    %c0_27 = arith.constant 0 : index
    %c0_28 = arith.constant 0 : index
    %58 = vector.load %arg12[%c0_27, %c0_28] : memref<1x32xf32, #tpu.memory_space<vmem>>, vector<1x32xf32>
    %c0_29 = arith.constant 0 : index
    %c0_30 = arith.constant 0 : index
    %59 = vector.load %arg13[%c0_29, %c0_30] : memref<1x32xf32, #tpu.memory_space<vmem>>, vector<1x32xf32>
    %cst_31 = arith.constant dense<0.000000e+00> : vector<8xf32>
    %60 = vector.multi_reduction <add>, %57, %cst_31 [1] : vector<8x32xf32> to vector<8xf32>
    %61 = vector.shape_cast %60 : vector<8xf32> to vector<8x1xf32>
    %cst_32 = arith.constant 3.200000e+01 : f32
    %62 = vector.broadcast %cst_32 : f32 to vector<8x1xf32>
    %63 = arith.divf %61, %62 : vector<8x1xf32>
    %64 = vector.broadcast %63 : vector<8x1xf32> to vector<8x32xf32>
    %65 = arith.subf %57, %64 : vector<8x32xf32>
    %66 = arith.mulf %65, %65 : vector<8x32xf32>
    %cst_33 = arith.constant dense<0.000000e+00> : vector<8xf32>
    %67 = vector.multi_reduction <add>, %66, %cst_33 [1] : vector<8x32xf32> to vector<8xf32>
    %68 = vector.shape_cast %67 : vector<8xf32> to vector<8x1xf32>
    %cst_34 = arith.constant 3.200000e+01 : f32
    %69 = vector.broadcast %cst_34 : f32 to vector<8x1xf32>
    %70 = arith.divf %68, %69 : vector<8x1xf32>
    %71 = vector.broadcast %63 : vector<8x1xf32> to vector<8x32xf32>
    %72 = arith.subf %57, %71 : vector<8x32xf32>
    %cst_35 = arith.constant 9.99999974E-6 : f32
    %73 = vector.broadcast %cst_35 : f32 to vector<8x1xf32>
    %74 = arith.addf %70, %73 : vector<8x1xf32>
    %75 = math.rsqrt %74 : vector<8x1xf32>
    %76 = vector.broadcast %75 : vector<8x1xf32> to vector<8x32xf32>
    %77 = arith.mulf %72, %76 : vector<8x32xf32>
    %78 = vector.broadcast %58 : vector<1x32xf32> to vector<8x32xf32>
    %79 = arith.mulf %77, %78 : vector<8x32xf32>
    %80 = vector.broadcast %59 : vector<1x32xf32> to vector<8x32xf32>
    %81 = arith.addf %79, %80 : vector<8x32xf32>
    %82 = vector.extract_strided_slice %48 {offsets = [0, 0], sizes = [8, 32], strides = [1, 1]} : vector<16x32xf32> to vector<8x32xf32>
    %83 = vector.extract_strided_slice %81 {offsets = [0, 0], sizes = [4, 32], strides = [1, 1]} : vector<8x32xf32> to vector<4x32xf32>
    %84 = vector.extract_strided_slice %48 {offsets = [8, 0], sizes = [8, 32], strides = [1, 1]} : vector<16x32xf32> to vector<8x32xf32>
    %85 = vector.extract_strided_slice %81 {offsets = [4, 0], sizes = [4, 32], strides = [1, 1]} : vector<8x32xf32> to vector<4x32xf32>
    %86 = tpu.concatenate %82, %83, %84, %85 in 0 : vector<8x32xf32>, vector<4x32xf32>, vector<8x32xf32>, vector<4x32xf32> -> vector<24x32xf32>
    %c0_36 = arith.constant 0 : index
    %c0_37 = arith.constant 0 : index
    %87 = vector.load %arg14[%c0_36, %c0_37] : memref<32x96xf32, #tpu.memory_space<vmem>>, vector<32x96xf32>
    %cst_38 = arith.constant dense<0.000000e+00> : vector<24x96xf32>
    %88 = tpu.matmul %86, %87, %cst_38 {dimension_numbers = #tpu.dot_dimension_numbers<[1], [0], [0], [1], [0, 0, 1, 1], [], []>} : vector<24x32xf32>, vector<32x96xf32>, vector<24x96xf32> -> vector<24x96xf32>
    %c0_39 = arith.constant 0 : index
    %c0_40 = arith.constant 0 : index
    %89 = vector.load %arg15[%c0_39, %c0_40] : memref<1x96xf32, #tpu.memory_space<vmem>>, vector<1x96xf32>
    %90 = vector.broadcast %89 : vector<1x96xf32> to vector<24x96xf32>
    %91 = arith.addf %88, %90 : vector<24x96xf32>
    %92 = vector.extract_strided_slice %91 {offsets = [0, 0], sizes = [12, 96], strides = [1, 1]} : vector<24x96xf32> to vector<12x96xf32>
    %93 = vector.extract_strided_slice %91 {offsets = [12, 0], sizes = [12, 96], strides = [1, 1]} : vector<24x96xf32> to vector<12x96xf32>
    %94 = vector.shape_cast %92 : vector<12x96xf32> to vector<1x12x96xf32>
    %95 = vector.shape_cast %93 : vector<12x96xf32> to vector<1x12x96xf32>
    %96 = tpu.concatenate %94, %95 in 0 : vector<1x12x96xf32>, vector<1x12x96xf32> -> vector<2x12x96xf32>
    %c0_41 = arith.constant 0 : index
    %c0_42 = arith.constant 0 : index
    %c0_43 = arith.constant 0 : index
    %97 = vector.load %arg2[%c0_41, %c0_42, %c0_43] : memref<2x1x12xf32, #tpu.memory_space<vmem>>, vector<2x1x12xf32>
    %98 = vector.extract_strided_slice %96 {offsets = [0, 0, 0], sizes = [2, 12, 8], strides = [1, 1, 1]} : vector<2x12x96xf32> to vector<2x12x8xf32>
    %99 = vector.extract_strided_slice %96 {offsets = [0, 0, 32], sizes = [2, 12, 8], strides = [1, 1, 1]} : vector<2x12x96xf32> to vector<2x12x8xf32>
    %100 = vector.extract_strided_slice %96 {offsets = [0, 0, 64], sizes = [2, 12, 8], strides = [1, 1, 1]} : vector<2x12x96xf32> to vector<2x12x8xf32>
    "tpu.trace_start"() <{level = 10 : i32, message = "bqd,bkd->bqk"}> : () -> ()
    %cst_44 = arith.constant dense<0.000000e+00> : vector<2x12x12xf32>
    %101 = tpu.matmul %98, %99, %cst_44 {dimension_numbers = #tpu.dot_dimension_numbers<[2], [2], [1], [1], [0, 0, 0, 1, 1, 1], [0], [0]>} : vector<2x12x8xf32>, vector<2x12x8xf32>, vector<2x12x12xf32> -> vector<2x12x12xf32>
    "tpu.trace_stop"() : () -> ()
    %cst_45 = arith.constant 0.353553385 : f32
    %102 = vector.broadcast %cst_45 : f32 to vector<2x12x12xf32>
    %103 = arith.mulf %101, %102 : vector<2x12x12xf32>
    %104 = vector.broadcast %97 : vector<2x1x12xf32> to vector<2x12x12xf32>
    %105 = arith.addf %103, %104 : vector<2x12x12xf32>
    %cst_46 = arith.constant dense<0xFF800000> : vector<2x12xf32>
    %106 = vector.multi_reduction <maximumf>, %105, %cst_46 [2] : vector<2x12x12xf32> to vector<2x12xf32>
    %107 = vector.shape_cast %106 : vector<2x12xf32> to vector<2x12x1xf32>
    %108 = vector.broadcast %107 : vector<2x12x1xf32> to vector<2x12x12xf32>
    %109 = arith.subf %105, %108 : vector<2x12x12xf32>
    %110 = math.exp %109 : vector<2x12x12xf32>
    %cst_47 = arith.constant dense<0.000000e+00> : vector<2x12xf32>
    %111 = vector.multi_reduction <add>, %110, %cst_47 [2] : vector<2x12x12xf32> to vector<2x12xf32>
    %112 = vector.shape_cast %111 : vector<2x12xf32> to vector<2x12x1xf32>
    "tpu.trace_start"() <{level = 10 : i32, message = "bqk,bkd->bqd"}> : () -> ()
    %cst_48 = arith.constant dense<0.000000e+00> : vector<2x12x8xf32>
    %113 = tpu.matmul %110, %100, %cst_48 {dimension_numbers = #tpu.dot_dimension_numbers<[2], [1], [1], [2], [0, 0, 0, 1, 1, 2], [0], [0]>} : vector<2x12x12xf32>, vector<2x12x8xf32>, vector<2x12x8xf32> -> vector<2x12x8xf32>
    "tpu.trace_stop"() : () -> ()
    %114 = tpu.reciprocal %112 {approx = true} : vector<2x12x1xf32> -> vector<2x12x1xf32>
    %115 = vector.broadcast %114 : vector<2x12x1xf32> to vector<2x12x8xf32>
    %116 = arith.mulf %113, %115 : vector<2x12x8xf32>
    %117 = vector.extract_strided_slice %96 {offsets = [0, 0, 8], sizes = [2, 12, 8], strides = [1, 1, 1]} : vector<2x12x96xf32> to vector<2x12x8xf32>
    %118 = vector.extract_strided_slice %96 {offsets = [0, 0, 40], sizes = [2, 12, 8], strides = [1, 1, 1]} : vector<2x12x96xf32> to vector<2x12x8xf32>
    %119 = vector.extract_strided_slice %96 {offsets = [0, 0, 72], sizes = [2, 12, 8], strides = [1, 1, 1]} : vector<2x12x96xf32> to vector<2x12x8xf32>
    "tpu.trace_start"() <{level = 10 : i32, message = "bqd,bkd->bqk"}> : () -> ()
    %cst_49 = arith.constant dense<0.000000e+00> : vector<2x12x12xf32>
    %120 = tpu.matmul %117, %118, %cst_49 {dimension_numbers = #tpu.dot_dimension_numbers<[2], [2], [1], [1], [0, 0, 0, 1, 1, 1], [0], [0]>} : vector<2x12x8xf32>, vector<2x12x8xf32>, vector<2x12x12xf32> -> vector<2x12x12xf32>
    "tpu.trace_stop"() : () -> ()
    %cst_50 = arith.constant 0.353553385 : f32
    %121 = vector.broadcast %cst_50 : f32 to vector<2x12x12xf32>
    %122 = arith.mulf %120, %121 : vector<2x12x12xf32>
    %123 = vector.broadcast %97 : vector<2x1x12xf32> to vector<2x12x12xf32>
    %124 = arith.addf %122, %123 : vector<2x12x12xf32>
    %cst_51 = arith.constant dense<0xFF800000> : vector<2x12xf32>
    %125 = vector.multi_reduction <maximumf>, %124, %cst_51 [2] : vector<2x12x12xf32> to vector<2x12xf32>
    %126 = vector.shape_cast %125 : vector<2x12xf32> to vector<2x12x1xf32>
    %127 = vector.broadcast %126 : vector<2x12x1xf32> to vector<2x12x12xf32>
    %128 = arith.subf %124, %127 : vector<2x12x12xf32>
    %129 = math.exp %128 : vector<2x12x12xf32>
    %cst_52 = arith.constant dense<0.000000e+00> : vector<2x12xf32>
    %130 = vector.multi_reduction <add>, %129, %cst_52 [2] : vector<2x12x12xf32> to vector<2x12xf32>
    %131 = vector.shape_cast %130 : vector<2x12xf32> to vector<2x12x1xf32>
    "tpu.trace_start"() <{level = 10 : i32, message = "bqk,bkd->bqd"}> : () -> ()
    %cst_53 = arith.constant dense<0.000000e+00> : vector<2x12x8xf32>
    %132 = tpu.matmul %129, %119, %cst_53 {dimension_numbers = #tpu.dot_dimension_numbers<[2], [1], [1], [2], [0, 0, 0, 1, 1, 2], [0], [0]>} : vector<2x12x12xf32>, vector<2x12x8xf32>, vector<2x12x8xf32> -> vector<2x12x8xf32>
    "tpu.trace_stop"() : () -> ()
    %133 = tpu.reciprocal %131 {approx = true} : vector<2x12x1xf32> -> vector<2x12x1xf32>
    %134 = vector.broadcast %133 : vector<2x12x1xf32> to vector<2x12x8xf32>
    %135 = arith.mulf %132, %134 : vector<2x12x8xf32>
    %136 = vector.extract_strided_slice %96 {offsets = [0, 0, 16], sizes = [2, 12, 8], strides = [1, 1, 1]} : vector<2x12x96xf32> to vector<2x12x8xf32>
    %137 = vector.extract_strided_slice %96 {offsets = [0, 0, 48], sizes = [2, 12, 8], strides = [1, 1, 1]} : vector<2x12x96xf32> to vector<2x12x8xf32>
    %138 = vector.extract_strided_slice %96 {offsets = [0, 0, 80], sizes = [2, 12, 8], strides = [1, 1, 1]} : vector<2x12x96xf32> to vector<2x12x8xf32>
    "tpu.trace_start"() <{level = 10 : i32, message = "bqd,bkd->bqk"}> : () -> ()
    %cst_54 = arith.constant dense<0.000000e+00> : vector<2x12x12xf32>
    %139 = tpu.matmul %136, %137, %cst_54 {dimension_numbers = #tpu.dot_dimension_numbers<[2], [2], [1], [1], [0, 0, 0, 1, 1, 1], [0], [0]>} : vector<2x12x8xf32>, vector<2x12x8xf32>, vector<2x12x12xf32> -> vector<2x12x12xf32>
    "tpu.trace_stop"() : () -> ()
    %cst_55 = arith.constant 0.353553385 : f32
    %140 = vector.broadcast %cst_55 : f32 to vector<2x12x12xf32>
    %141 = arith.mulf %139, %140 : vector<2x12x12xf32>
    %142 = vector.broadcast %97 : vector<2x1x12xf32> to vector<2x12x12xf32>
    %143 = arith.addf %141, %142 : vector<2x12x12xf32>
    %cst_56 = arith.constant dense<0xFF800000> : vector<2x12xf32>
    %144 = vector.multi_reduction <maximumf>, %143, %cst_56 [2] : vector<2x12x12xf32> to vector<2x12xf32>
    %145 = vector.shape_cast %144 : vector<2x12xf32> to vector<2x12x1xf32>
    %146 = vector.broadcast %145 : vector<2x12x1xf32> to vector<2x12x12xf32>
    %147 = arith.subf %143, %146 : vector<2x12x12xf32>
    %148 = math.exp %147 : vector<2x12x12xf32>
    %cst_57 = arith.constant dense<0.000000e+00> : vector<2x12xf32>
    %149 = vector.multi_reduction <add>, %148, %cst_57 [2] : vector<2x12x12xf32> to vector<2x12xf32>
    %150 = vector.shape_cast %149 : vector<2x12xf32> to vector<2x12x1xf32>
    "tpu.trace_start"() <{level = 10 : i32, message = "bqk,bkd->bqd"}> : () -> ()
    %cst_58 = arith.constant dense<0.000000e+00> : vector<2x12x8xf32>
    %151 = tpu.matmul %148, %138, %cst_58 {dimension_numbers = #tpu.dot_dimension_numbers<[2], [1], [1], [2], [0, 0, 0, 1, 1, 2], [0], [0]>} : vector<2x12x12xf32>, vector<2x12x8xf32>, vector<2x12x8xf32> -> vector<2x12x8xf32>
    "tpu.trace_stop"() : () -> ()
    %152 = tpu.reciprocal %150 {approx = true} : vector<2x12x1xf32> -> vector<2x12x1xf32>
    %153 = vector.broadcast %152 : vector<2x12x1xf32> to vector<2x12x8xf32>
    %154 = arith.mulf %151, %153 : vector<2x12x8xf32>
    %155 = vector.extract_strided_slice %96 {offsets = [0, 0, 24], sizes = [2, 12, 8], strides = [1, 1, 1]} : vector<2x12x96xf32> to vector<2x12x8xf32>
    %156 = vector.extract_strided_slice %96 {offsets = [0, 0, 56], sizes = [2, 12, 8], strides = [1, 1, 1]} : vector<2x12x96xf32> to vector<2x12x8xf32>
    %157 = vector.extract_strided_slice %96 {offsets = [0, 0, 88], sizes = [2, 12, 8], strides = [1, 1, 1]} : vector<2x12x96xf32> to vector<2x12x8xf32>
    "tpu.trace_start"() <{level = 10 : i32, message = "bqd,bkd->bqk"}> : () -> ()
    %cst_59 = arith.constant dense<0.000000e+00> : vector<2x12x12xf32>
    %158 = tpu.matmul %155, %156, %cst_59 {dimension_numbers = #tpu.dot_dimension_numbers<[2], [2], [1], [1], [0, 0, 0, 1, 1, 1], [0], [0]>} : vector<2x12x8xf32>, vector<2x12x8xf32>, vector<2x12x12xf32> -> vector<2x12x12xf32>
    "tpu.trace_stop"() : () -> ()
    %cst_60 = arith.constant 0.353553385 : f32
    %159 = vector.broadcast %cst_60 : f32 to vector<2x12x12xf32>
    %160 = arith.mulf %158, %159 : vector<2x12x12xf32>
    %161 = vector.broadcast %97 : vector<2x1x12xf32> to vector<2x12x12xf32>
    %162 = arith.addf %160, %161 : vector<2x12x12xf32>
    %cst_61 = arith.constant dense<0xFF800000> : vector<2x12xf32>
    %163 = vector.multi_reduction <maximumf>, %162, %cst_61 [2] : vector<2x12x12xf32> to vector<2x12xf32>
    %164 = vector.shape_cast %163 : vector<2x12xf32> to vector<2x12x1xf32>
    %165 = vector.broadcast %164 : vector<2x12x1xf32> to vector<2x12x12xf32>
    %166 = arith.subf %162, %165 : vector<2x12x12xf32>
    %167 = math.exp %166 : vector<2x12x12xf32>
    %cst_62 = arith.constant dense<0.000000e+00> : vector<2x12xf32>
    %168 = vector.multi_reduction <add>, %167, %cst_62 [2] : vector<2x12x12xf32> to vector<2x12xf32>
    %169 = vector.shape_cast %168 : vector<2x12xf32> to vector<2x12x1xf32>
    "tpu.trace_start"() <{level = 10 : i32, message = "bqk,bkd->bqd"}> : () -> ()
    %cst_63 = arith.constant dense<0.000000e+00> : vector<2x12x8xf32>
    %170 = tpu.matmul %167, %157, %cst_63 {dimension_numbers = #tpu.dot_dimension_numbers<[2], [1], [1], [2], [0, 0, 0, 1, 1, 2], [0], [0]>} : vector<2x12x12xf32>, vector<2x12x8xf32>, vector<2x12x8xf32> -> vector<2x12x8xf32>
    "tpu.trace_stop"() : () -> ()
    %171 = tpu.reciprocal %169 {approx = true} : vector<2x12x1xf32> -> vector<2x12x1xf32>
    %172 = vector.broadcast %171 : vector<2x12x1xf32> to vector<2x12x8xf32>
    %173 = arith.mulf %170, %172 : vector<2x12x8xf32>
    %174 = tpu.concatenate %116, %135, %154, %173 in 2 : vector<2x12x8xf32>, vector<2x12x8xf32>, vector<2x12x8xf32>, vector<2x12x8xf32> -> vector<2x12x32xf32>
    %175 = vector.extract_strided_slice %174 {offsets = [0, 0, 0], sizes = [1, 12, 32], strides = [1, 1, 1]} : vector<2x12x32xf32> to vector<1x12x32xf32>
    %176 = vector.shape_cast %175 : vector<1x12x32xf32> to vector<12x32xf32>
    %177 = vector.extract_strided_slice %174 {offsets = [1, 0, 0], sizes = [1, 12, 32], strides = [1, 1, 1]} : vector<2x12x32xf32> to vector<1x12x32xf32>
    %178 = vector.shape_cast %177 : vector<1x12x32xf32> to vector<12x32xf32>
    %179 = tpu.concatenate %176, %178 in 0 : vector<12x32xf32>, vector<12x32xf32> -> vector<24x32xf32>
    %c0_64 = arith.constant 0 : index
    %c0_65 = arith.constant 0 : index
    %180 = vector.load %arg16[%c0_64, %c0_65] : memref<32x32xf32, #tpu.memory_space<vmem>>, vector<32x32xf32>
    %cst_66 = arith.constant dense<0.000000e+00> : vector<24x32xf32>
    %181 = tpu.matmul %179, %180, %cst_66 {dimension_numbers = #tpu.dot_dimension_numbers<[1], [0], [0], [1], [0, 0, 1, 1], [], []>} : vector<24x32xf32>, vector<32x32xf32>, vector<24x32xf32> -> vector<24x32xf32>
    %c0_67 = arith.constant 0 : index
    %c0_68 = arith.constant 0 : index
    %182 = vector.load %arg17[%c0_67, %c0_68] : memref<1x32xf32, #tpu.memory_space<vmem>>, vector<1x32xf32>
    %183 = vector.broadcast %182 : vector<1x32xf32> to vector<24x32xf32>
    %184 = arith.addf %181, %183 : vector<24x32xf32>
    %185 = arith.addf %86, %184 : vector<24x32xf32>
    %c0_69 = arith.constant 0 : index
    %c0_70 = arith.constant 0 : index
    %186 = vector.load %arg18[%c0_69, %c0_70] : memref<1x32xf32, #tpu.memory_space<vmem>>, vector<1x32xf32>
    %c0_71 = arith.constant 0 : index
    %c0_72 = arith.constant 0 : index
    %187 = vector.load %arg19[%c0_71, %c0_72] : memref<1x32xf32, #tpu.memory_space<vmem>>, vector<1x32xf32>
    %cst_73 = arith.constant dense<0.000000e+00> : vector<24xf32>
    %188 = vector.multi_reduction <add>, %185, %cst_73 [1] : vector<24x32xf32> to vector<24xf32>
    %189 = vector.shape_cast %188 : vector<24xf32> to vector<24x1xf32>
    %cst_74 = arith.constant 3.200000e+01 : f32
    %190 = vector.broadcast %cst_74 : f32 to vector<24x1xf32>
    %191 = arith.divf %189, %190 : vector<24x1xf32>
    %192 = vector.broadcast %191 : vector<24x1xf32> to vector<24x32xf32>
    %193 = arith.subf %185, %192 : vector<24x32xf32>
    %194 = arith.mulf %193, %193 : vector<24x32xf32>
    %cst_75 = arith.constant dense<0.000000e+00> : vector<24xf32>
    %195 = vector.multi_reduction <add>, %194, %cst_75 [1] : vector<24x32xf32> to vector<24xf32>
    %196 = vector.shape_cast %195 : vector<24xf32> to vector<24x1xf32>
    %cst_76 = arith.constant 3.200000e+01 : f32
    %197 = vector.broadcast %cst_76 : f32 to vector<24x1xf32>
    %198 = arith.divf %196, %197 : vector<24x1xf32>
    %199 = vector.broadcast %191 : vector<24x1xf32> to vector<24x32xf32>
    %200 = arith.subf %185, %199 : vector<24x32xf32>
    %cst_77 = arith.constant 9.99999974E-6 : f32
    %201 = vector.broadcast %cst_77 : f32 to vector<24x1xf32>
    %202 = arith.addf %198, %201 : vector<24x1xf32>
    %203 = math.rsqrt %202 : vector<24x1xf32>
    %204 = vector.broadcast %203 : vector<24x1xf32> to vector<24x32xf32>
    %205 = arith.mulf %200, %204 : vector<24x32xf32>
    %206 = vector.broadcast %186 : vector<1x32xf32> to vector<24x32xf32>
    %207 = arith.mulf %205, %206 : vector<24x32xf32>
    %208 = vector.broadcast %187 : vector<1x32xf32> to vector<24x32xf32>
    %209 = arith.addf %207, %208 : vector<24x32xf32>
    %c0_78 = arith.constant 0 : index
    %c0_79 = arith.constant 0 : index
    %210 = vector.load %arg20[%c0_78, %c0_79] : memref<32x64xf32, #tpu.memory_space<vmem>>, vector<32x64xf32>
    %cst_80 = arith.constant dense<0.000000e+00> : vector<24x64xf32>
    %211 = tpu.matmul %209, %210, %cst_80 {dimension_numbers = #tpu.dot_dimension_numbers<[1], [0], [0], [1], [0, 0, 1, 1], [], []>} : vector<24x32xf32>, vector<32x64xf32>, vector<24x64xf32> -> vector<24x64xf32>
    %c0_81 = arith.constant 0 : index
    %c0_82 = arith.constant 0 : index
    %212 = vector.load %arg21[%c0_81, %c0_82] : memref<1x64xf32, #tpu.memory_space<vmem>>, vector<1x64xf32>
    %213 = vector.broadcast %212 : vector<1x64xf32> to vector<24x64xf32>
    %214 = arith.addf %211, %213 : vector<24x64xf32>
    %215 = arith.mulf %214, %214 : vector<24x64xf32>
    %216 = arith.mulf %214, %215 : vector<24x64xf32>
    %cst_83 = arith.constant 4.471500e-02 : f32
    %217 = vector.broadcast %cst_83 : f32 to vector<24x64xf32>
    %218 = arith.mulf %217, %216 : vector<24x64xf32>
    %219 = arith.addf %214, %218 : vector<24x64xf32>
    %cst_84 = arith.constant 0.797884583 : f32
    %220 = vector.broadcast %cst_84 : f32 to vector<24x64xf32>
    %221 = arith.mulf %220, %219 : vector<24x64xf32>
    %222 = math.tanh %221 : vector<24x64xf32>
    %cst_85 = arith.constant 1.000000e+00 : f32
    %223 = vector.broadcast %cst_85 : f32 to vector<24x64xf32>
    %224 = arith.addf %223, %222 : vector<24x64xf32>
    %cst_86 = arith.constant 5.000000e-01 : f32
    %225 = vector.broadcast %cst_86 : f32 to vector<24x64xf32>
    %226 = arith.mulf %225, %224 : vector<24x64xf32>
    %227 = arith.mulf %214, %226 : vector<24x64xf32>
    %c0_87 = arith.constant 0 : index
    %c0_88 = arith.constant 0 : index
    %228 = vector.load %arg22[%c0_87, %c0_88] : memref<64x32xf32, #tpu.memory_space<vmem>>, vector<64x32xf32>
    %cst_89 = arith.constant dense<0.000000e+00> : vector<24x32xf32>
    %229 = tpu.matmul %227, %228, %cst_89 {dimension_numbers = #tpu.dot_dimension_numbers<[1], [0], [0], [1], [0, 0, 1, 1], [], []>} : vector<24x64xf32>, vector<64x32xf32>, vector<24x32xf32> -> vector<24x32xf32>
    %c0_90 = arith.constant 0 : index
    %c0_91 = arith.constant 0 : index
    %230 = vector.load %arg23[%c0_90, %c0_91] : memref<1x32xf32, #tpu.memory_space<vmem>>, vector<1x32xf32>
    %231 = vector.broadcast %230 : vector<1x32xf32> to vector<24x32xf32>
    %232 = arith.addf %229, %231 : vector<24x32xf32>
    %233 = arith.addf %209, %232 : vector<24x32xf32>
    %c0_92 = arith.constant 0 : index
    %c0_93 = arith.constant 0 : index
    %234 = vector.load %arg24[%c0_92, %c0_93] : memref<1x32xf32, #tpu.memory_space<vmem>>, vector<1x32xf32>
    %c0_94 = arith.constant 0 : index
    %c0_95 = arith.constant 0 : index
    %235 = vector.load %arg25[%c0_94, %c0_95] : memref<1x32xf32, #tpu.memory_space<vmem>>, vector<1x32xf32>
    %cst_96 = arith.constant dense<0.000000e+00> : vector<24xf32>
    %236 = vector.multi_reduction <add>, %233, %cst_96 [1] : vector<24x32xf32> to vector<24xf32>
    %237 = vector.shape_cast %236 : vector<24xf32> to vector<24x1xf32>
    %cst_97 = arith.constant 3.200000e+01 : f32
    %238 = vector.broadcast %cst_97 : f32 to vector<24x1xf32>
    %239 = arith.divf %237, %238 : vector<24x1xf32>
    %240 = vector.broadcast %239 : vector<24x1xf32> to vector<24x32xf32>
    %241 = arith.subf %233, %240 : vector<24x32xf32>
    %242 = arith.mulf %241, %241 : vector<24x32xf32>
    %cst_98 = arith.constant dense<0.000000e+00> : vector<24xf32>
    %243 = vector.multi_reduction <add>, %242, %cst_98 [1] : vector<24x32xf32> to vector<24xf32>
    %244 = vector.shape_cast %243 : vector<24xf32> to vector<24x1xf32>
    %cst_99 = arith.constant 3.200000e+01 : f32
    %245 = vector.broadcast %cst_99 : f32 to vector<24x1xf32>
    %246 = arith.divf %244, %245 : vector<24x1xf32>
    %247 = vector.broadcast %239 : vector<24x1xf32> to vector<24x32xf32>
    %248 = arith.subf %233, %247 : vector<24x32xf32>
    %cst_100 = arith.constant 9.99999974E-6 : f32
    %249 = vector.broadcast %cst_100 : f32 to vector<24x1xf32>
    %250 = arith.addf %246, %249 : vector<24x1xf32>
    %251 = math.rsqrt %250 : vector<24x1xf32>
    %252 = vector.broadcast %251 : vector<24x1xf32> to vector<24x32xf32>
    %253 = arith.mulf %248, %252 : vector<24x32xf32>
    %254 = vector.broadcast %234 : vector<1x32xf32> to vector<24x32xf32>
    %255 = arith.mulf %253, %254 : vector<24x32xf32>
    %256 = vector.broadcast %235 : vector<1x32xf32> to vector<24x32xf32>
    %257 = arith.addf %255, %256 : vector<24x32xf32>
    %c0_101 = arith.constant 0 : index
    %c0_102 = arith.constant 0 : index
    %258 = vector.load %arg26[%c0_101, %c0_102] : memref<24x32xf32, #tpu.memory_space<vmem>>, vector<24x32xf32>
    tpu.vector_store %arg26[%c0_101, %c0_102], %257 {strides = array<i32>} : memref<24x32xf32, #tpu.memory_space<vmem>>, vector<24x32xf32>,
    return
  }
}

</mosaic_0001>

<bundles_post_ra>
// kernel: multimodal_encoder_forward.1
= control target key start
LH: loop header
LB: loop body
LE: loop exit
PB: predicated region body
PF: predicated region fallthrough
CT: control target
= control target key end

     0   :  { %v3498_v0 = vmov 0   ;;  %vm132_vm2 = vcmask 523264   ;;  %vm378_vm7 = vcmask 1043456   ;;  %vm219_vm8 = vcmask 261120   ;;  %s3508_s29 = smov 80   ;;  %s4331_s0 = inlined_call_operand.vmem [shape: s32[16,1], index: 0, kind: input, shape index: {}]   ;;  %s4332_s9 = inlined_call_operand.vmem [shape: f32[256,32], index: 9, kind: input, shape index: {}]   ;;  %s4333_s4 = inlined_call_operand.vmem [shape: f32[64,32], index: 4, kind: input, shape index: {}]   ;;  %s4334_s3 = inlined_call_operand.vmem [shape: f32[8,256], index: 3, kind: input, shape index: {}]   ;;  %s4335_s1 = inlined_call_operand.vmem [shape: s32[16,1], index: 1, kind: input, shape index: {}]   ;;  %s4336_s5 = inlined_call_operand.vmem [shape: f32[2,32], index: 5, kind: input, shape index: {}]   ;;  %s4337_s11 = inlined_call_operand.vmem [shape: f32[4,32], index: 11, kind: input, shape index: {}]   ;;  %s4338_s10 = inlined_call_operand.vmem [shape: f32[1,32], index: 10, kind: input, shape index: {}]   ;;  %s4339_s6 = inlined_call_operand.vmem [shape: f32[8,32], index: 6, kind: input, shape index: {}]   ;;  %s4340_s14 = inlined_call_operand.vmem [shape: f32[32,96], index: 14, kind: input, shape index: {}]   ;;  %s4341_s7 = inlined_call_operand.vmem [shape: f32[1,32], index: 7, kind: input, shape index: {}]   ;;  %s4342_s8 = inlined_call_operand.vmem [shape: f32[1,32], index: 8, kind: input, shape index: {}]   ;;  %s4343_s12 = inlined_call_operand.vmem [shape: f32[1,32], index: 12, kind: input, shape index: {}]   ;;  %s4344_s13 = inlined_call_operand.vmem [shape: f32[1,32], index: 13, kind: input, shape index: {}]   ;;  %s4345_s15 = inlined_call_operand.vmem [shape: f32[1,96], index: 15, kind: input, shape index: {}]   ;;  %s4346_s2 = inlined_call_operand.vmem [shape: f32[2,1,12], index: 2, kind: input, shape index: {}]   ;;  %s4347_s16 = inlined_call_operand.vmem [shape: f32[32,32], index: 16, kind: input, shape index: {}]   ;;  %s4348_s17 = inlined_call_operand.vmem [shape: f32[1,32], index: 17, kind: input, shape index: {}]   ;;  %s4349_s20 = inlined_call_operand.vmem [shape: f32[32,64], index: 20, kind: input, shape index: {}]   ;;  %s4350_s18 = inlined_call_operand.vmem [shape: f32[1,32], index: 18, kind: input, shape index: {}]   ;;  %s4351_s19 = inlined_call_operand.vmem [shape: f32[1,32], index: 19, kind: input, shape index: {}]   ;;  %s4352_s22 = inlined_call_operand.vmem [shape: f32[64,32], index: 22, kind: input, shape index: {}]   ;;  %s4353_s21 = inlined_call_operand.vmem [shape: f32[1,64], index: 21, kind: input, shape index: {}]   ;;  %s4354_s23 = inlined_call_operand.vmem [shape: f32[1,32], index: 23, kind: input, shape index: {}]   ;;  %s4355_s24 = inlined_call_operand.vmem [shape: f32[1,32], index: 24, kind: input, shape index: {}]   ;;  %s4356_s25 = inlined_call_operand.vmem [shape: f32[1,32], index: 25, kind: input, shape index: {}]   ;;  %s4357_s26 = inlined_call_operand.vmem [shape: f32[24,32], index: 26, kind: output, shape index: {}]  }
   0x1   :  { %4364 = sst [smem:[#allocation2_spill]] %s4331_s0  ;;  %3328 = vset.pattern.permute.xlu0 %v3498_v0  ;;  %3329 = vset.pattern.permute.xlu1 %v3498_v0  ;;  %vm3501_vm9 = vmmov 0   ;;  %vm527_vm10 = vcmask 64512   ;;  %vm3505_vm12 = vmmov 1   ;;  %vm722_vm14 = vcmask 93184  }
   0x2   :  { %4365 = sst [smem:[#allocation3_spill]] %s4332_s9  ;;  %vm3895_vm11 = vmpackc.low %vm527_vm10, %vm527_vm10  ;;  %vm718_vm15 = vcmask 97280  }
   0x3   :  { %4366 = sst [smem:[#allocation4_spill]] %s4333_s4  ;;  %s4376_s0 = sld [smem:[#allocation3_spill]]  ;;  %vm3904_vm13 = vmpackc.low %vm378_vm7, %vm3505_vm12 }
   0x4   :  { %4367 = sst [smem:[#allocation5_spill]] %s4334_s3  ;;  %s4377_s28 = sld [smem:[#allocation4_spill]] }
   0x5   :  { %4368 = sst [smem:[#allocation6_spill]] %s4335_s1  ;;  %s3511_s4 = smov 72  }
   0x6   :  { %4369 = sst [smem:[#allocation7_spill]] %s4336_s5  ;;  %s4378_s5 = sld [smem:[#allocation5_spill]] }
   0x7   :  { %4370 = sst [smem:[#allocation8_spill]] %s4337_s11  ;;  %s4380_s9 = sld [smem:[#allocation7_spill]] }
   0x8   :  { %4371 = sst [smem:[#allocation9_spill]] %s4338_s10  ;;  %s4375_s10 = sld [smem:[#allocation2_spill]] }
   0x9   :  { %4372 = sst [smem:[#allocation10_spill]] %s4339_s6  ;;  %v281_v3 = vld [vmem:[%s4376_s0 + $0x80] sm:$0xff]  ;;  %v282_v4 = vld [vmem:[%s4376_s0 + $0x88] sm:$0xff]  ;;  %v283_v9 = vld [vmem:[%s4376_s0 + $0x90] sm:$0xff]  ;;  %s4381_s1 = sld [smem:[#allocation8_spill]] }
   0xa   :  { %4373 = sst [smem:[#allocation11_spill]] %s4340_s14  ;;  %v265_v5 = vld [vmem:[%s4376_s0] sm:$0xff]  ;;  %v266_v6 = vld [vmem:[%s4376_s0 + $0x8] sm:$0xff]  ;;  %v3151_v7 = vpack.c.bf16 %v282_v4, %v281_v3  ;;  %v284_v10 = vld [vmem:[%s4376_s0 + $0x98] sm:$0xff]  ;;  %s4382_s30 = sld [smem:[#allocation9_spill]] }
   0xb   :  { %4374 = sst [smem:[#allocation12_spill]] %s4341_s7  ;;  %v3153_v8 = vpack.c.bf16 %v266_v6, %v265_v5  ;;  %v267_v11 = vld [vmem:[%s4376_s0 + $0x10] sm:$0xff]  ;;  %v3155_v12 = vpack.c.bf16 %v284_v10, %v283_v9  ;;  %v268_v13 = vld [vmem:[%s4376_s0 + $0x18] sm:$0xff]  ;;  %v285_v14 = vld [vmem:[%s4376_s0 + $0xa0] sm:$0xff]  ;;  %v85_v5 = vlaneseq  ;;  %s4383_s11 = sld [smem:[#allocation10_spill]] }
   0xc   :  { %v286_v15 = vld [vmem:[%s4376_s0 + $0xa8] sm:$0xff]  ;;  %3152 = vmatprep.subr.bf16.mxu1 %v3151_v7  ;;  %v3157_v16 = vpack.c.bf16 %v268_v13, %v267_v11  ;;  %v269_v17 = vld [vmem:[%s4376_s0 + $0x20] sm:$0xff]  ;;  %v287_v22 = vld [vmem:[%s4376_s0 + $0xb0] sm:$0xff]  ;;  %s4384_s27 = sld [smem:[#allocation11_spill]]  ;;  %s3509_s14 = smov 112  }
   0xd   :  { %3154 = vmatpush3.bf16.msra.mxu1 %v3153_v8  ;;  %v3159_v18 = vpack.c.bf16 %v286_v15, %v285_v14  ;;  %v270_v19 = vld [vmem:[%s4376_s0 + $0x28] sm:$0xff]  ;;  %v99_v20 = vld [vmem:[%s4377_s28] sm:$0xff]  ;;  %v288_v23 = vld [vmem:[%s4376_s0 + $0xb8] sm:$0xff]  ;;  %v86_v6 = vand.u32 127, %v85_v5  ;;  %v3499_v8 = vmov 0.0   ;;  %v123_v15 = vshrl.u32 %v85_v5, 7 }
   0xe   :  { %v83_v1 = vld [vmem:[%s4375_s10] sm:$0xff]  ;;  %v84_v2 = vld [vmem:[%s4375_s10 + $0x8] sm:$0xff]  ;;  %3156 = vmatprep.subr.bf16.mxu1 %v3155_v12  ;;  %v101_v25 = vld [vmem:[%s4377_s28 + $0x10] sm:$0xff]  ;;  %v3161_v27 = vpack.c.bf16 %v270_v19, %v269_v17  ;;  %v3163_v30 = vpack.c.bf16 %v288_v23, %v287_v22  ;;  %s3512_s7 = smov 104   ;;  %s3515_s3 = smov 16  }
   0xf   :  { %88 = vperm.xlu0 %3328, %v83_v1   ;;  %v100_v21 = vld [vmem:[%s4377_s28 + $0x8] sm:$0xff]  ;;  %v102_v26 = vld [vmem:[%s4377_s28 + $0x18] sm:$0xff]  ;;  %v271_v28 = vld [vmem:[%s4376_s0 + $0x30] sm:$0xff]  ;;  %v124_v17 = vsub.s32 0, %v123_v15 }
  0x10   :  { %v3135_v24 = vpack.c.bf16 %v100_v21, %v99_v20  ;;  %v3139_v29 = vpack.c.bf16 %v102_v26, %v101_v25  ;;  %v272_v31 = vld [vmem:[%s4376_s0 + $0x38] sm:$0xff]  ;;  %v103_v32 = vld [vmem:[%s4377_s28 + $0x20] sm:$0xff]  ;;  %v104_v33 = vld [vmem:[%s4377_s28 + $0x28] sm:$0xff] }
  0x11   :  { %3158 = vmatpush3.bf16.msra.mxu1 %v3157_v16  ;;  %v289_v34 = vld [vmem:[%s4376_s0 + $0xc0] sm:$0xff]  ;;  %v290_v35 = vld [vmem:[%s4376_s0 + $0xc8] sm:$0xff]  ;;  %v3143_v36 = vpack.c.bf16 %v104_v33, %v103_v32  ;;  %v105_v37 = vld [vmem:[%s4377_s28 + $0x30] sm:$0xff]  ;;  %v3165_v39 = vpack.c.bf16 %v272_v31, %v271_v28 }
  0x12   :  { %3136 = vmatprep.subr.bf16.mxu0 %v3135_v24  ;;  %3160 = vmatprep.subr.bf16.mxu1 %v3159_v18  ;;  %v106_v38 = vld [vmem:[%s4377_s28 + $0x38] sm:$0xff]  ;;  %v273_v40 = vld [vmem:[%s4376_s0 + $0x40] sm:$0xff]  ;;  %v3167_v41 = vpack.c.bf16 %v290_v35, %v289_v34  ;;  %v274_v42 = vld [vmem:[%s4376_s0 + $0x48] sm:$0xff]  ;;  %s4379_s28 = sld [smem:[#allocation6_spill]]  ;;  %v128_v18 = vsub.s32 1, %v123_v15 }
  0x13   :  { %91 = vperm.xlu0 %3328, %v84_v2   ;;  %3138 = vmatpush3.bf16.msra.mxu0 %v3135_v24  ;;  %v264_v43 = vld [vmem:[%s4378_s5 + $0x8] sm:$0xff]  ;;  %v291_v45 = vld [vmem:[%s4376_s0 + $0xd0] sm:$0xff]  ;;  %v292_v46 = vld [vmem:[%s4376_s0 + $0xd8] sm:$0xff]  ;;  %v3147_v47 = vpack.c.bf16 %v106_v38, %v105_v37  ;;  %v3169_v50 = vpack.c.bf16 %v274_v42, %v273_v40 }
  0x14   :  { %3140 = vmatprep.subr.bf16.mxu0 %v3139_v29  ;;  %368 = vmatprep.mubr.f32.mxu1 %v264_v43  ;;  %v3171_v51 = vpack.c.bf16 %v292_v46, %v291_v45  ;;  %v275_v52 = vld [vmem:[%s4376_s0 + $0x50] sm:$0xff]  ;;  %v276_v53 = vld [vmem:[%s4376_s0 + $0x58] sm:$0xff]  ;;  %v293_v55 = vld [vmem:[%s4376_s0 + $0xe0] sm:$0xff] }
  0x15   :  { %3162 = vmatpush3.bf16.msra.mxu1 %v3161_v27  ;;  %v294_v56 = vld [vmem:[%s4376_s0 + $0xe8] sm:$0xff]  ;;  %v3173_v57 = vpack.c.bf16 %v276_v53, %v275_v52  ;;  %v277_v59 = vld [vmem:[%s4376_s0 + $0x60] sm:$0xff]  ;;  %v295_v61 = vld [vmem:[%s4376_s0 + $0xf0] sm:$0xff] }
  0x16   :  { %3164 = vmatprep.subr.bf16.mxu1 %v3163_v30  ;;  %v3175_v58 = vpack.c.bf16 %v294_v56, %v293_v55  ;;  %v278_v60 = vld [vmem:[%s4376_s0 + $0x68] sm:$0xff]  ;;  %v296_v62 = vld [vmem:[%s4376_s0 + $0xf8] sm:$0xff]  ;;  %v279_v1 = vld [vmem:[%s4376_s0 + $0x70] sm:$0xff] }
  0x17   :  { %3142 = vmatpush3.bf16.msra.mxu0 %v3139_v29  ;;  %v3177_v63 = vpack.c.bf16 %v278_v60, %v277_v59  ;;  %v280_v2 = vld [vmem:[%s4376_s0 + $0x78] sm:$0xff]  ;;  %v263_v4 = vld [vmem:[%s4378_s5] sm:$0xff]  ;;  %v3500_v59 = vmov 0.0|0.0   ;;  %v417_v60 = vld [vmem:[%s4384_s27 + $0x10] sm:$0xff]  ;;  %s3504_s0 = smov 88  }
  0x18   :  { %v108_v44 = vld [vmem:[%s4379_s28] sm:$0xff]  ;;  %3144 = vmatprep.subr.bf16.mxu0 %v3143_v36  ;;  %v109_v48 = vld [vmem:[%s4379_s28 + $0x8] sm:$0xff]  ;;  %v3181_v3 = vpack.c.bf16 %v280_v2, %v279_v1  ;;  %s3514_s28 = smov 8  }
  0x19   :  { %vm110_vm0 = vcmp.eq.s32.totalorder %v108_v44, 0  ;;  %vm111_vm1 = vcmp.eq.s32.totalorder %v109_v48, 0  ;;  %3166 = vmatpush3.bf16.msra.mxu1 %v3165_v39  ;;  %v107_v19 = vld [vmem:[%s4380_s9] sm:$0x3] }
  0x1a   :  { %v112_v49 = vsel %vm110_vm0, 1, %v3498_v0  ;;  %3168 = vmatprep.subr.bf16.mxu1 %v3167_v41  ;;  %v113_v54 = vsel %vm111_vm1, 1, %v3498_v0  ;;  %v3179_v0 = vpack.c.bf16 %v296_v62, %v295_v61  ;;  %v125_v21 = vrot.slane %v107_v19, %v124_v17  ;;  %v374_v23 = vld [vmem:[%s4381_s1] sm:$0xf]  ;;  %v418_v61 = vld [vmem:[%s4384_s27 + $0x18] sm:$0xff]  ;;  %s3506_s1 = smov 120  }
  0x1b   :  { %115 = vperm.xlu1 %3329, %v112_v49   ;;  %3146 = vmatpush3.bf16.msra.mxu0 %v3143_v36  ;;  %v129_v22 = vrot.slane %v107_v19, %v128_v18  ;;  %v2706_v24 = vld [vmem:[%s4382_s30] ss:$0 sm:$0xff]  ;;  %v376_v25 = vrot.slane %v374_v23, 4  ;;  %v3187_v62 = vpack.c.bf16 %v418_v61, %v417_v60  ;;  %s4385_s30 = sld [smem:[#allocation12_spill]]  ;;  %vm2222_vm0 = vcmask 130048  }
  0x1c   :  { %3148 = vmatprep.subr.bf16.mxu0 %v3147_v47  ;;  %v214_v29 = vld [vmem:[%s4383_s11] sm:$0xff]  ;;  %s3513_s11 = smov 40   ;;  %vm2227_vm1 = vcmask 195584  }
  0x1d   :  { %3170 = vmatpush3.bf16.msra.mxu1 %v3169_v50  ;;  %v379_v33 = vsel %vm378_vm7, %v374_v23, %v376_v25  ;;  %v415_v56 = vld [vmem:[%s4384_s27] sm:$0xff] }
  0x1e   :  { %3172 = vmatprep.subr.bf16.mxu1 %v3171_v51  ;;  %v2707_v18 = vld [vmem:[%s4343_s12] ss:$0 sm:$0xff] }
  0x1f   :  { %118 = vperm.xlu1 %3329, %v113_v54   ;;  %3150 = vmatpush3.bf16.msra.mxu0 %v3147_v47 }
  0x20   :  { %3183 = vmatprep.subr.bf16.mxu0 %v3500_v59 }
  0x21   :  { %3174 = vmatpush3.bf16.msra.mxu1 %v3173_v57  ;;  %v416_v57 = vld [vmem:[%s4384_s27 + $0x8] sm:$0xff] }
  0x22   :  { %3176 = vmatprep.subr.bf16.mxu1 %v3175_v58  ;;  %v3184_v58 = vpack.c.bf16 %v416_v57, %v415_v56 }
  0x25   :  { %3178 = vmatpush3.bf16.msra.mxu1 %v3177_v63 }
  0x26   :  { %3180 = vmatprep.subr.bf16.mxu1 %v3179_v0 }
  0x29   :  { %3182 = vmatpush3.bf16.msra.mxu1 %v3181_v3 }
  0x2c   :  { %369 = vmatmul.mubr.f32.vlgmr.msra.gmra.mrb[0].mxu1 %v263_v4 }
  0x8e   :  { %v89_v7 = vpop.permute.xlu0 %88 }
  0x8f   :  { %vm93_vm3 = vcmp.eq.s32.totalorder %v89_v7, %v86_v6 }
  0x90   :  { %v2700_v9 = vsel %vm93_vm3, 1.0, %v3499_v8 }
  0x91   :  { %2944 = vmatprep.mubr.msk.f32.mxu0 %vm132_vm2, %v2700_v9 }
  0x92   :  { %v92_v10 = vpop.permute.xlu0 %91 }
  0x93   :  { %vm94_vm4 = vcmp.eq.s32.totalorder %v92_v10, %v86_v6  ;;  %v2704_v10 = vld [vmem:[%s4385_s30] ss:$0 sm:$0xff]  ;;  %s3510_s30 = smov 48  }
  0x94   :  { %v2701_v11 = vsel %vm94_vm4, 1.0, %v3499_v8 }
  0x95   :  { %2945 = vmatmul.mubr.msk.f32.vlgmr.msra.gmra.mrb[0].mxu0 %vm132_vm2, %v2701_v11 }
  0x96   :  { %3185 = vmatpush3.bf16.msra.mxu0 %v3184_v58  ;;  %2955 = vmatprep.mubr.msk.f32.mxu0 %vm3501_vm9, %v3499_v8 }
  0x97   :  { %3186 = vmatprep.subr.bf16.mxu0 %v3500_v59 }
  0x9a   :  { %v116_v16 = vpop.permute.xlu1 %115  ;;  %3188 = vmatpush3.bf16.msra.mxu0 %v3187_v62 }
  0x9b   :  { %vm120_vm6 = vcmp.eq.s32.totalorder %v116_v16, 1 }
  0x9c   :  { %v130_v31 = vsel %vm120_vm6, %v125_v21, %v129_v22 }
  0x9e   :  { %v119_v20 = vpop.permute.xlu1 %118 }
  0x9f   :  { %vm121_vm5 = vcmp.eq.s32.totalorder %v119_v20, 1 }
  0xa0   :  { %v131_v26 = vsel %vm121_vm5, %v125_v21, %v129_v22  ;;  %v2708_v22 = vld [vmem:[%s4344_s13] ss:$0 sm:$0xff]  ;;  %s3502_s13 = smov 96  }
  0xff   :  { %v2829_v12 = vpop.f32.mrb[0].mxu1 }
 0x100   :  { %v2830_v13 = vpop.f32.mrb[1].mxu1 }
 0x101   :  { %v2831_v14 = vadd.f32 %v2830_v13, %v2829_v12 }
 0x103   :  { %v371_v28 = vadd.f32 %v2831_v14, %v2706_v24  ;;  %v2705_v14 = vld [vmem:[%s4342_s8] ss:$0 sm:$0xff] }
 0x105   :  { %v380_v37 = vadd.f32 %v379_v33, %v371_v28  ;;  %v2709_v28 = vld [vmem:[%s4345_s15] ss:$0 sm:$0xff]  ;;  %s3503_s15 = smov 64  }
 0x107   :  { %v383_v40 = vsel %vm219_vm8, %v380_v37, 0.0 }
 0x168   :  { %v2946_v27 = vpop.f32.mrb[0].mxu0 }
 0x169   :  { %v211_v30 = vadd.f32 %v2946_v27, %v131_v26  ;;  %v205_v32 = vpop.f32.mrb[1].mxu0 }
 0x16a   :  { %v206_v34 = vadd.f32 %v205_v32, %v130_v31 }
 0x16b   :  { %v216_v35 = vadd.f32 %v214_v29, %v211_v30 }
 0x16c   :  { %v215_v36 = vadd.f32 %v214_v29, %v206_v34 }
 0x16d   :  { %v223_v38 = vsel %vm219_vm8, %v216_v35, 0.0 }
 0x16e   :  { %224 = vadd.xlane.f32.xlu1 %v223_v38  ;;  %v220_v39 = vsel %vm219_vm8, %v215_v36, 0.0 }
 0x16f   :  { %221 = vadd.xlane.f32.xlu0 %v220_v39 }
 0x173   :  { %384 = vadd.xlane.f32.xlu0 %v383_v40 }
 0x1fb   :  { %v225_v41 = vpop.xlane.xlu1 %224 }
 0x1fc   :  { %v228_v42 = vmul.f32 0.03125, %v225_v41  ;;  %v222_v43 = vpop.xlane.xlu0 %221 }
 0x1fd   :  { %v227_v44 = vmul.f32 0.03125, %v222_v43 }
 0x1fe   :  { %v230_v45 = vsub.f32 %v216_v35, %v228_v42 }
 0x1ff   :  { %v229_v46 = vsub.f32 %v215_v36, %v227_v44 }
 0x200   :  { %v385_v47 = vpop.xlane.xlu0 %384  ;;  %v232_v48 = vmul.f32 %v230_v45, %v230_v45 }
 0x201   :  { %v386_v49 = vmul.f32 0.03125, %v385_v47  ;;  %v231_v50 = vmul.f32 %v229_v46, %v229_v46 }
 0x202   :  { %v236_v51 = vsel %vm219_vm8, %v232_v48, 0.0 }
 0x203   :  { %v387_v52 = vsub.f32 %v380_v37, %v386_v49  ;;  %237 = vadd.xlane.f32.xlu1 %v236_v51  ;;  %v233_v53 = vsel %vm219_vm8, %v231_v50, 0.0 }
 0x204   :  { %234 = vadd.xlane.f32.xlu0 %v233_v53 }
 0x205   :  { %v388_v54 = vmul.f32 %v387_v52, %v387_v52 }
 0x207   :  { %v389_v55 = vsel %vm219_vm8, %v388_v54, 0.0 }
 0x208   :  { %390 = vadd.xlane.f32.xlu0 %v389_v55 }
 0x290   :  { %v238_v63 = vpop.xlane.xlu1 %237 }
 0x291   :  { %v240_v0 = vmul.f32 0.03125, %v238_v63  ;;  %v235_v1 = vpop.xlane.xlu0 %234  ;;  %v3929_v63 = vld [vmem:[%s4346_s2] ss:$0 sm:$0xff] }
 0x292   :  { %v239_v2 = vmul.f32 0.03125, %v235_v1 }
 0x293   :  { %v242_v3 = vadd.f32 1e-05, %v240_v0 }
 0x294   :  { %v241_v4 = vadd.f32 1e-05, %v239_v2 }
 0x295   :  { %3410 = vrsqrt.f32 %v242_v3  ;;  %v391_v5 = vpop.xlane.xlu0 %390 }
 0x296   :  { %3412 = vrsqrt.f32 %v241_v4  ;;  %v392_v6 = vmul.f32 0.03125, %v391_v5 }
 0x298   :  { %v393_v7 = vadd.f32 1e-05, %v392_v6 }
 0x29a   :  { %3414 = vrsqrt.f32 %v393_v7 }
 0x29f   :  { %v3411_v9 = vpop.eup %3410 }
 0x2a0   :  { %v3413_v11 = vpop.eup %3412  ;;  %v246_v12 = vmul.f32 %v3411_v9, %v230_v45 }
 0x2a1   :  { %v245_v13 = vmul.f32 %v3413_v11, %v229_v46 }
 0x2a2   :  { %v254_v15 = vmul.f32 %v2704_v10, %v246_v12  ;;  %v3942_v12 = vld [vmem:[%s4346_s2 + $0x1] ss:$0 sm:$0xff]  ;;  %s3507_s2 = smov 56  }
 0x2a3   :  { %v253_v16 = vmul.f32 %v2704_v10, %v245_v13 }
 0x2a4   :  { %v3415_v17 = vpop.eup %3414  ;;  %v262_v20 = vadd.f32 %v2705_v14, %v254_v15 }
 0x2a5   :  { %v3842_v19 = vadd.f32 %v2705_v14, %v253_v16  ;;  %v395_v21 = vmul.f32 %v3415_v17, %v387_v52 }
 0x2a6   :  { %v411_v25 = vrot.slane %v262_v20, 4 }
 0x2a7   :  { %2956 = vmatmul.mubr.msk.f32.vlgmr.msra.gmra.mrb[2].mxu0 %vm219_vm8, %v3842_v19  ;;  %v402_v23 = vmul.f32 %v2707_v18, %v395_v21 }
 0x2a8   :  { %2958 = vmatprep.mubr.msk.f32.mxu0 %vm3501_vm9, %v3499_v8 }
 0x2a9   :  { %v409_v24 = vadd.f32 %v2708_v22, %v402_v23 }
 0x2ab   :  { %v3852_v26 = vsel %vm378_vm7, %v409_v24, %v411_v25  ;;  %v3859_v27 = vsel %vm378_vm7, %v411_v25, %v409_v24 }
 0x2ac   :  { %2959 = vmatmul.mubr.msk.f32.gmra.mrb[4].mxu0 %vm219_vm8, %v3852_v26 }
 0x2ad   :  { %2961 = vmatprep.mubr.msk.f32.mxu0 %vm3501_vm9, %v3499_v8 }
 0x2b0   :  { %2962 = vmatmul.mubr.msk.f32.gmra.mrb[6].mxu0 %vm219_vm8, %v3859_v27 }
 0x37a   :  { %v501_v29 = vpop.f32.mrb[2].mxu0 }
 0x37b   :  { %v3866_v30 = vadd.f32 %v2709_v28, %v501_v29  ;;  %v2957_v31 = vpop.f32.mrb[3].mxu0 }
 0x37d   :  { %2968 = vmatprep.mubr.msk.f32.mxu0 %vm527_vm10, %v3866_v30 }
 0x37f   :  { %v506_v32 = vpop.f32.mrb[4].mxu0 }
 0x380   :  { %v3870_v33 = vadd.f32 %v2709_v28, %v506_v32  ;;  %v2960_v34 = vpop.f32.mrb[5].mxu0 }
 0x382   :  { %v3874_v35 = vpack.i.bf16 %v3870_v33, %v3866_v30  ;;  %v517_v40 = vrot.slane %v3870_v33, 4 }
 0x383   :  { %v511_v36 = vpop.f32.mrb[6].mxu0 }
 0x384   :  { %v512_v37 = vadd.f32 %v2709_v28, %v511_v36  ;;  %3331 = vrot.lane.b32.xlu1 %v3874_v35, %s3502_s13  ;;  %v2963_v38 = vpop.f32.mrb[7].mxu0 }
 0x386   :  { %v3877_v39 = vrot.slane %v512_v37, 4 }
 0x388   :  { %3341 = vrot.lane.b32.xlu1 %v3874_v35, %s3503_s15  ;;  %v3884_v41 = vsel %vm378_vm7, %v517_v40, %v3877_v39 }
 0x389   :  { %v3888_v42 = vpack.i.bf16 %v3877_v39, %v3884_v41 }
 0x38b   :  { %3336 = vrot.lane.b32.xlu0 %v3888_v42, %s3502_s13 }
 0x38c   :  { %3351 = vrot.lane.b32.xlu1 %v3874_v35, %s3504_s0 }
 0x3f6   :  { %v3332_v43 = vpop.permute.xlu1 %3331 }
 0x3f7   :  { %v3334_v44 = vunpack.i.h.bf16 %v3332_v43  ;;  %v3333_v45 = vunpack.i.l.bf16 %v3332_v43 }
 0x3f9   :  { %v3189_v47 = vpack.c.bf16 %v3334_v44, %v3333_v45 }
 0x3fa   :  { %v3342_v48 = vpop.permute.xlu1 %3341 }
 0x3fb   :  { %3191 = vmatprep.subr.msk.bf16.mxu0 %vm3895_vm11, %v3189_v47  ;;  %v3344_v53 = vunpack.i.h.bf16 %v3342_v48  ;;  %v3343_v54 = vunpack.i.l.bf16 %v3342_v48 }
 0x3fc   :  { %3194 = vmatpush3.bf16.xpose.msk.msra.mxu0 %vm3895_vm11, %v3189_v47 }
 0x3fd   :  { %v3337_v49 = vpop.permute.xlu0 %3336  ;;  %v3201_v61 = vpack.c.bf16 %v3344_v53, %v3343_v54 }
 0x3fe   :  { %v3339_v50 = vunpack.i.h.bf16 %v3337_v49  ;;  %v3338_v51 = vunpack.i.l.bf16 %v3337_v49  ;;  %v3352_v52 = vpop.permute.xlu1 %3351 }
 0x3ff   :  { %v3354_v55 = vunpack.i.h.bf16 %v3352_v52  ;;  %v3353_v56 = vunpack.i.l.bf16 %v3352_v52 }
 0x400   :  { %v3195_v57 = vpack.c.bf16 %v3339_v50, %v3338_v51 }
 0x401   :  { %v3213_v58 = vpack.c.bf16 %v3354_v55, %v3353_v56 }
 0x402   :  { %3197 = vmatprep.subr.msk.bf16.mxu0 %vm3895_vm11, %v3195_v57 }
 0x403   :  { %2969 = vmatmul.mubr.msk.f32.vlgmr.msra.gmra.mrb[8].mxu0 %vm527_vm10, %v3870_v33  ;;  %3215 = vmatprep.subr.msk.bf16.mxu1 %vm3895_vm11, %v3213_v58 }
 0x404   :  { %3200 = vmatpush3.bf16.xpose.msk.msra.mxu0 %vm3895_vm11, %v3195_v57  ;;  %2975 = vmatprep.mubr.msk.f32.mxu0 %vm527_vm10, %v3884_v41 }
 0x405   :  { %3218 = vmatpush3.bf16.xpose.msk.msra.mxu1 %vm3895_vm11, %v3213_v58  ;;  %3203 = vmatprep.subr.msk.bf16.mxu0 %vm3904_vm13, %v3201_v61 }
 0x40b   :  { %2976 = vmatmul.mubr.msk.f32.vlgmr.msra.gmra.mrb[10].mxu0 %vm527_vm10, %v3877_v39 }
 0x40c   :  { %3206 = vmatpush3.bf16.msk.msra.mxu0 %vm3904_vm13, %v3201_v61 }
 0x4d6   :  { %v2970_v62 = vpop.f32.mrb[8].mxu0 }
 0x4d7   :  { %v699_v0 = vmul.f32 0.35355338, %v2970_v62  ;;  %v602_v1 = vpop.f32.mrb[9].mxu0 }
 0x4d8   :  { %v698_v2 = vmul.f32 0.35355338, %v602_v1 }
 0x4d9   :  { %v715_v3 = vadd.f32 %v3929_v63, %v699_v0 }
 0x4da   :  { %v714_v4 = vadd.f32 %v3929_v63, %v698_v2 }
 0x4db   :  { %v723_v5 = vsel %vm722_vm14, %v715_v3, -inf }
 0x4dc   :  { %724 = vmax.xlane.f32.xlu0 %v723_v5  ;;  %v719_v6 = vsel %vm718_vm15, %v714_v4, -inf }
 0x4dd   :  { %720 = vmax.xlane.f32.xlu1 %v719_v6 }
 0x4de   :  { %v2977_v7 = vpop.f32.mrb[10].mxu0 }
 0x4df   :  { %v689_v9 = vpop.f32.mrb[11].mxu0  ;;  %v701_v10 = vmul.f32 0.35355338, %v2977_v7 }
 0x4e0   :  { %v700_v11 = vmul.f32 0.35355338, %v689_v9 }
 0x4e1   :  { %v717_v13 = vadd.f32 %v3942_v12, %v701_v10 }
 0x4e2   :  { %v716_v14 = vadd.f32 %v3942_v12, %v700_v11 }
 0x4e3   :  { %v729_v15 = vsel %vm722_vm14, %v717_v13, -inf }
 0x4e4   :  { %v726_v16 = vsel %vm718_vm15, %v716_v14, -inf }
 0x4ee   :  { %3356 = vrot.lane.b32.xlu1 %v3888_v42, %s3504_s0 }
 0x4f2   :  { %3346 = vrot.lane.b32.xlu0 %v3888_v42, %s3503_s15 }
 0x511   :  { %730 = vmax.xlane.f32.xlu0 %v729_v15 }
 0x512   :  { %727 = vmax.xlane.f32.xlu1 %v726_v16 }
 0x523   :  { %942 = vrot.lane.b32.xlu1 %v3870_v33, %s3506_s1 }
 0x527   :  { %940 = vrot.lane.b32.xlu0 %v3866_v30, %s3506_s1  ;;  %1033 = vrot.lane.b32.xlu1 %v3877_v39, %s3506_s1 }
 0x52b   :  { %1031 = vrot.lane.b32.xlu0 %v3884_v41, %s3506_s1 }
 0x569   :  { %v725_v17 = vpop.xlane.xlu0 %724 }
 0x56a   :  { %v733_v18 = vsub.f32 %v715_v3, %v725_v17  ;;  %v721_v20 = vpop.xlane.xlu1 %720 }
 0x56b   :  { %v732_v21 = vsub.f32 %v714_v4, %v721_v20 }
 0x56c   :  { %v738_v22 = vmul.f32 1.442695, %v733_v18 }
 0x56d   :  { %v736_v23 = vmul.f32 1.442695, %v732_v21  ;;  %v3347_v24 = vpop.permute.xlu0 %3346 }
 0x56e   :  { %v3349_v25 = vunpack.i.h.bf16 %v3347_v24  ;;  %v3348_v28 = vunpack.i.l.bf16 %v3347_v24  ;;  %v3357_v31 = vpop.permute.xlu1 %3356 }
 0x56f   :  { %3416 = vpow2.f32 %v736_v23  ;;  %v3359_v32 = vunpack.i.h.bf16 %v3357_v31  ;;  %v3358_v34 = vunpack.i.l.bf16 %v3357_v31 }
 0x570   :  { %3418 = vpow2.f32 %v738_v22  ;;  %v3207_v29 = vpack.c.bf16 %v3349_v25, %v3348_v28 }
 0x571   :  { %v3219_v38 = vpack.c.bf16 %v3359_v32, %v3358_v34 }
 0x572   :  { %3209 = vmatprep.subr.msk.bf16.mxu0 %vm3904_vm13, %v3207_v29 }
 0x579   :  { %v3954_v36 = vpop.eup %3416 }
 0x57a   :  { %v3956_v37 = vpop.eup %3418  ;;  %2982 = vmatprep.mubr.msk.f32.mxu0 %vm718_vm15, %v3954_v36 }
 0x57b   :  { %2983 = vmatmul.mubr.msk.f32.vlgmr.msra.gmra.mrb[12].mxu0 %vm718_vm15, %v3956_v37 }
 0x57c   :  { %3212 = vmatpush3.bf16.msk.msra.mxu0 %vm3904_vm13, %v3207_v29 }
 0x57d   :  { %3221 = vmatprep.subr.msk.bf16.mxu0 %vm3895_vm11, %v3219_v38 }
 0x59e   :  { %v731_v40 = vpop.xlane.xlu0 %730 }
 0x59f   :  { %v735_v43 = vsub.f32 %v717_v13, %v731_v40  ;;  %v728_v44 = vpop.xlane.xlu1 %727 }
 0x5a0   :  { %v734_v45 = vsub.f32 %v716_v14, %v728_v44 }
 0x5a1   :  { %v742_v47 = vmul.f32 1.442695, %v735_v43 }
 0x5a2   :  { %v740_v48 = vmul.f32 1.442695, %v734_v45  ;;  %v941_v49 = vpop.permute.xlu0 %940 }
 0x5a3   :  { %2996 = vmatprep.mubr.msk.f32.mxu1 %vm527_vm10, %v941_v49  ;;  %v943_v50 = vpop.permute.xlu1 %942 }
 0x5a4   :  { %3420 = vpow2.f32 %v740_v48  ;;  %2997 = vmatmul.mubr.msk.f32.vlgmr.msra.gmra.mrb[2].mxu1 %vm527_vm10, %v943_v50 }
 0x5a5   :  { %3422 = vpow2.f32 %v742_v47 }
 0x5a6   :  { %v1032_v53 = vpop.permute.xlu0 %1031 }
 0x5a7   :  { %v1034_v54 = vpop.permute.xlu1 %1033 }
 0x5ae   :  { %v3968_v51 = vpop.eup %3420 }
 0x5af   :  { %v3970_v52 = vpop.eup %3422  ;;  %2989 = vmatprep.mubr.msk.f32.mxu0 %vm718_vm15, %v3968_v51 }
 0x5b0   :  { %2990 = vmatmul.mubr.msk.f32.vlgmr.msra.gmra.mrb[14].mxu0 %vm718_vm15, %v3970_v52  ;;  %v753_v60 = vsel %vm722_vm14, %v3970_v52, 0.0 }
 0x5b1   :  { %3224 = vmatpush3.bf16.xpose.msk.msra.mxu0 %vm3895_vm11, %v3219_v38  ;;  %3003 = vmatprep.mubr.msk.f32.mxu0 %vm527_vm10, %v1032_v53 }
 0x5b8   :  { %3004 = vmatmul.mubr.msk.f32.vlgmr.msra.gmra.mrb[16].mxu0 %vm527_vm10, %v1034_v54 }
 0x64e   :  { %v3980_v55 = vpop.f32.mrb[12].mxu0 }
 0x64f   :  { %v3982_v56 = vpop.f32.mrb[13].mxu0 }
 0x677   :  { %v2998_v57 = vpop.f32.mrb[2].mxu1 }
 0x678   :  { %v1123_v58 = vmul.f32 0.35355338, %v2998_v57  ;;  %v1022_v61 = vpop.f32.mrb[3].mxu1 }
 0x679   :  { %v1122_v62 = vmul.f32 0.35355338, %v1022_v61 }
 0x67a   :  { %v1127_v0 = vadd.f32 %v3929_v63, %v1123_v58 }
 0x67b   :  { %v1126_v1 = vadd.f32 %v3929_v63, %v1122_v62 }
 0x67c   :  { %v1133_v2 = vsel %vm722_vm14, %v1127_v0, -inf }
 0x67d   :  { %1134 = vmax.xlane.f32.xlu1 %v1133_v2  ;;  %v1130_v3 = vsel %vm718_vm15, %v1126_v1, -inf }
 0x67e   :  { %1131 = vmax.xlane.f32.xlu0 %v1130_v3 }
 0x683   :  { %v3988_v4 = vpop.f32.mrb[14].mxu0 }
 0x684   :  { %v3990_v5 = vpop.f32.mrb[15].mxu0 }
 0x68b   :  { %v3005_v6 = vpop.f32.mrb[16].mxu0 }
 0x68c   :  { %v1125_v7 = vmul.f32 0.35355338, %v3005_v6  ;;  %v1113_v9 = vpop.f32.mrb[17].mxu0 }
 0x68d   :  { %v1124_v10 = vmul.f32 0.35355338, %v1113_v9 }
 0x68e   :  { %3361 = vrot.lane.b32.xlu1 %v3874_v35, %s3507_s2  ;;  %v1129_v11 = vadd.f32 %v3942_v12, %v1125_v7 }
 0x68f   :  { %v1128_v14 = vadd.f32 %v3942_v12, %v1124_v10 }
 0x690   :  { %v1139_v13 = vsel %vm722_vm14, %v1129_v11, -inf }
 0x691   :  { %1140 = vmax.xlane.f32.xlu0 %v1139_v13  ;;  %v1136_v15 = vsel %vm718_vm15, %v1128_v14, -inf }
 0x692   :  { %3371 = vrot.lane.b32.xlu1 %v3874_v35, %s3508_s29 }
 0x695   :  { %1137 = vmax.xlane.f32.xlu0 %v1136_v15 }
 0x696   :  { %3376 = vrot.lane.b32.xlu1 %v3888_v42, %s3508_s29 }
 0x69a   :  { %1352 = vrot.lane.b32.xlu1 %v3870_v33, %s3509_s14 }
 0x69e   :  { %1443 = vrot.lane.b32.xlu1 %v3877_v39, %s3509_s14 }
 0x6ab   :  { %3366 = vrot.lane.b32.xlu0 %v3888_v42, %s3507_s2 }
 0x6af   :  { %1350 = vrot.lane.b32.xlu0 %v3866_v30, %s3509_s14 }
 0x6b3   :  { %1441 = vrot.lane.b32.xlu0 %v3884_v41, %s3509_s14 }
 0x70a   :  { %v1135_v16 = vpop.xlane.xlu1 %1134 }
 0x70b   :  { %v1143_v17 = vsub.f32 %v1127_v0, %v1135_v16  ;;  %v1132_v18 = vpop.xlane.xlu0 %1131 }
 0x70c   :  { %v1142_v20 = vsub.f32 %v1126_v1, %v1132_v18 }
 0x70d   :  { %v1148_v21 = vmul.f32 1.442695, %v1143_v17 }
 0x70e   :  { %v1146_v22 = vmul.f32 1.442695, %v1142_v20  ;;  %v3362_v23 = vpop.permute.xlu1 %3361 }
 0x70f   :  { %v3364_v24 = vunpack.i.h.bf16 %v3362_v23  ;;  %v3363_v25 = vunpack.i.l.bf16 %v3362_v23 }
 0x710   :  { %3424 = vpow2.f32 %v1146_v22 }
 0x711   :  { %3426 = vpow2.f32 %v1148_v21  ;;  %v3225_v28 = vpack.c.bf16 %v3364_v24, %v3363_v25 }
 0x712   :  { %v3372_v29 = vpop.permute.xlu1 %3371 }
 0x713   :  { %v3374_v31 = vunpack.i.h.bf16 %v3372_v29  ;;  %v3373_v32 = vunpack.i.l.bf16 %v3372_v29  ;;  %3227 = vmatprep.subr.msk.bf16.mxu1 %vm3904_vm13, %v3225_v28 }
 0x714   :  { %3230 = vmatpush3.bf16.msk.msra.mxu1 %vm3904_vm13, %v3225_v28 }
 0x715   :  { %v3237_v34 = vpack.c.bf16 %v3374_v31, %v3373_v32 }
 0x716   :  { %v3377_v47 = vpop.permute.xlu1 %3376 }
 0x717   :  { %3239 = vmatprep.subr.msk.bf16.mxu1 %vm3895_vm11, %v3237_v34  ;;  %v3379_v53 = vunpack.i.h.bf16 %v3377_v47  ;;  %v3378_v57 = vunpack.i.l.bf16 %v3377_v47 }
 0x719   :  { %v3243_v1 = vpack.c.bf16 %v3379_v53, %v3378_v57 }
 0x71a   :  { %v4010_v38 = vpop.eup %3424  ;;  %v1353_v2 = vpop.permute.xlu1 %1352 }
 0x71b   :  { %v4012_v40 = vpop.eup %3426  ;;  %3010 = vmatprep.mubr.msk.f32.mxu1 %vm718_vm15, %v4010_v38 }
 0x71c   :  { %3011 = vmatmul.mubr.msk.f32.vlgmr.msra.gmra.mrb[4].mxu1 %vm718_vm15, %v4012_v40 }
 0x71d   :  { %3242 = vmatpush3.bf16.xpose.msk.msra.mxu1 %vm3895_vm11, %v3237_v34 }
 0x71e   :  { %v1141_v43 = vpop.xlane.xlu0 %1140  ;;  %v1444_v9 = vpop.permute.xlu1 %1443 }
 0x71f   :  { %v1145_v44 = vsub.f32 %v1129_v11, %v1141_v43 }
 0x721   :  { %v1152_v49 = vmul.f32 1.442695, %v1145_v44 }
 0x722   :  { %v1138_v45 = vpop.xlane.xlu0 %1137 }
 0x723   :  { %v1144_v48 = vsub.f32 %v1128_v14, %v1138_v45 }
 0x725   :  { %v1150_v50 = vmul.f32 1.442695, %v1144_v48 }
 0x726   :  { %v3367_v54 = vpop.permute.xlu0 %3366 }
 0x727   :  { %3428 = vpow2.f32 %v1150_v50  ;;  %v3369_v58 = vunpack.i.h.bf16 %v3367_v54  ;;  %v3368_v61 = vunpack.i.l.bf16 %v3367_v54 }
 0x728   :  { %3430 = vpow2.f32 %v1152_v49 }
 0x729   :  { %v3231_v62 = vpack.c.bf16 %v3369_v58, %v3368_v61 }
 0x72a   :  { %v1351_v0 = vpop.permute.xlu0 %1350 }
 0x72b   :  { %3233 = vmatprep.subr.msk.bf16.mxu0 %vm3904_vm13, %v3231_v62  ;;  %3024 = vmatprep.mubr.msk.f32.mxu1 %vm527_vm10, %v1351_v0 }
 0x72c   :  { %3236 = vmatpush3.bf16.msk.msra.mxu0 %vm3904_vm13, %v3231_v62  ;;  %3025 = vmatmul.mubr.msk.f32.vlgmr.msra.gmra.mrb[6].mxu1 %vm527_vm10, %v1353_v2 }
 0x72d   :  { %3245 = vmatprep.subr.msk.bf16.mxu0 %vm3895_vm11, %v3243_v1 }
 0x72e   :  { %v1442_v7 = vpop.permute.xlu0 %1441 }
 0x731   :  { %v4028_v3 = vpop.eup %3428 }
 0x732   :  { %v4030_v6 = vpop.eup %3430  ;;  %3017 = vmatprep.mubr.msk.f32.mxu0 %vm718_vm15, %v4028_v3 }
 0x733   :  { %3018 = vmatmul.mubr.msk.f32.vlgmr.msra.gmra.mrb[18].mxu0 %vm718_vm15, %v4030_v6 }
 0x734   :  { %3031 = vmatprep.mubr.msk.f32.mxu0 %vm527_vm10, %v1442_v7 }
 0x735   :  { %3248 = vmatpush3.bf16.xpose.msk.msra.mxu0 %vm3895_vm11, %v3243_v1 }
 0x73c   :  { %3032 = vmatmul.mubr.msk.f32.vlgmr.msra.gmra.mrb[20].mxu0 %vm527_vm10, %v1444_v9 }
 0x7ef   :  { %v4040_v10 = vpop.f32.mrb[4].mxu1 }
 0x7f0   :  { %v4042_v11 = vpop.f32.mrb[5].mxu1 }
 0x7ff   :  { %v3026_v13 = vpop.f32.mrb[6].mxu1 }
 0x800   :  { %v1533_v14 = vmul.f32 0.35355338, %v3026_v13  ;;  %v1432_v15 = vpop.f32.mrb[7].mxu1 }
 0x801   :  { %v1532_v16 = vmul.f32 0.35355338, %v1432_v15 }
 0x802   :  { %v1537_v17 = vadd.f32 %v3929_v63, %v1533_v14 }
 0x803   :  { %v1536_v18 = vadd.f32 %v3929_v63, %v1532_v16 }
 0x804   :  { %v1543_v20 = vsel %vm722_vm14, %v1537_v17, -inf }
 0x805   :  { %1544 = vmax.xlane.f32.xlu1 %v1543_v20  ;;  %v1540_v21 = vsel %vm718_vm15, %v1536_v18, -inf }
 0x806   :  { %v4048_v22 = vpop.f32.mrb[18].mxu0  ;;  %1541 = vmax.xlane.f32.xlu0 %v1540_v21 }
 0x807   :  { %v4050_v23 = vpop.f32.mrb[19].mxu0 }
 0x80f   :  { %v3033_v24 = vpop.f32.mrb[20].mxu0 }
 0x810   :  { %v1535_v25 = vmul.f32 0.35355338, %v3033_v24  ;;  %v1523_v28 = vpop.f32.mrb[21].mxu0 }
 0x811   :  { %v1534_v29 = vmul.f32 0.35355338, %v1523_v28 }
 0x812   :  { %v1539_v31 = vadd.f32 %v3942_v12, %v1535_v25 }
 0x813   :  { %v1538_v34 = vadd.f32 %v3942_v12, %v1534_v29 }
 0x814   :  { %v1549_v32 = vsel %vm722_vm14, %v1539_v31, -inf }
 0x815   :  { %1550 = vmax.xlane.f32.xlu0 %v1549_v32  ;;  %v1546_v43 = vsel %vm718_vm15, %v1538_v34, -inf }
 0x816   :  { %3381 = vrot.lane.b32.xlu1 %v3874_v35, %s3510_s30 }
 0x819   :  { %1547 = vmax.xlane.f32.xlu0 %v1546_v43 }
 0x81a   :  { %3391 = vrot.lane.b32.xlu1 %v3874_v35, %s3511_s4 }
 0x81e   :  { %3396 = vrot.lane.b32.xlu1 %v3888_v42, %s3511_s4 }
 0x822   :  { %1762 = vrot.lane.b32.xlu1 %v3870_v33, %s3512_s7 }
 0x826   :  { %1853 = vrot.lane.b32.xlu1 %v3877_v39, %s3512_s7 }
 0x82f   :  { %3386 = vrot.lane.b32.xlu0 %v3888_v42, %s3510_s30 }
 0x833   :  { %1760 = vrot.lane.b32.xlu0 %v3866_v30, %s3512_s7 }
 0x837   :  { %1851 = vrot.lane.b32.xlu0 %v3884_v41, %s3512_s7 }
 0x892   :  { %v1545_v44 = vpop.xlane.xlu1 %1544 }
 0x893   :  { %v1553_v45 = vsub.f32 %v1537_v17, %v1545_v44  ;;  %v1542_v47 = vpop.xlane.xlu0 %1541 }
 0x894   :  { %v1552_v48 = vsub.f32 %v1536_v18, %v1542_v47 }
 0x895   :  { %v1558_v49 = vmul.f32 1.442695, %v1553_v45 }
 0x896   :  { %v1556_v50 = vmul.f32 1.442695, %v1552_v48  ;;  %v3382_v53 = vpop.permute.xlu1 %3381 }
 0x897   :  { %v3384_v54 = vunpack.i.h.bf16 %v3382_v53  ;;  %v3383_v57 = vunpack.i.l.bf16 %v3382_v53 }
 0x898   :  { %3432 = vpow2.f32 %v1556_v50 }
 0x899   :  { %3434 = vpow2.f32 %v1558_v49  ;;  %v3249_v33 = vpack.c.bf16 %v3384_v54, %v3383_v57 }
 0x89a   :  { %v3392_v58 = vpop.permute.xlu1 %3391 }
 0x89b   :  { %v3394_v39 = vunpack.i.h.bf16 %v3392_v58  ;;  %v3393_v61 = vunpack.i.l.bf16 %v3392_v58  ;;  %3251 = vmatprep.subr.msk.bf16.mxu1 %vm3904_vm13, %v3249_v33 }
 0x89c   :  { %3254 = vmatpush3.bf16.msk.msra.mxu1 %vm3904_vm13, %v3249_v33 }
 0x89d   :  { %v3261_v30 = vpack.c.bf16 %v3394_v39, %v3393_v61 }
 0x89e   :  { %v3397_v7 = vpop.permute.xlu1 %3396 }
 0x89f   :  { %3263 = vmatprep.subr.msk.bf16.mxu1 %vm3895_vm11, %v3261_v30  ;;  %v3399_v15 = vunpack.i.h.bf16 %v3397_v7  ;;  %v3398_v17 = vunpack.i.l.bf16 %v3397_v7  ;;  %v1154_v7 = vsel %vm718_vm15, %v4010_v38, 0.0 }
 0x8a1   :  { %v3267_v25 = vpack.c.bf16 %v3399_v15, %v3398_v17 }
 0x8a2   :  { %v4070_v41 = vpop.eup %3432  ;;  %v1551_v62 = vpop.xlane.xlu0 %1550 }
 0x8a3   :  { %v4072_v0 = vpop.eup %3434  ;;  %3038 = vmatprep.mubr.msk.f32.mxu1 %vm718_vm15, %v4070_v41  ;;  %v1555_v1 = vsub.f32 %v1539_v31, %v1551_v62  ;;  %v1763_v28 = vpop.permute.xlu1 %1762 }
 0x8a4   :  { %3039 = vmatmul.mubr.msk.f32.vlgmr.msra.gmra.mrb[8].mxu1 %vm718_vm15, %v4072_v0 }
 0x8a5   :  { %3266 = vmatpush3.bf16.xpose.msk.msra.mxu1 %vm3895_vm11, %v3261_v30  ;;  %v1562_v13 = vmul.f32 1.442695, %v1555_v1 }
 0x8a6   :  { %v1548_v2 = vpop.xlane.xlu0 %1547 }
 0x8a7   :  { %v1554_v9 = vsub.f32 %v1538_v34, %v1548_v2  ;;  %v1854_v34 = vpop.permute.xlu1 %1853 }
 0x8a9   :  { %v1560_v14 = vmul.f32 1.442695, %v1554_v9  ;;  %v1564_v9 = vsel %vm718_vm15, %v4070_v41, 0.0 }
 0x8aa   :  { %v3387_v16 = vpop.permute.xlu0 %3386 }
 0x8ab   :  { %3436 = vpow2.f32 %v1560_v14  ;;  %v3389_v18 = vunpack.i.h.bf16 %v3387_v16  ;;  %v3388_v20 = vunpack.i.l.bf16 %v3387_v16 }
 0x8ac   :  { %3438 = vpow2.f32 %v1562_v13 }
 0x8ad   :  { %v3255_v21 = vpack.c.bf16 %v3389_v18, %v3388_v20 }
 0x8ae   :  { %v1761_v24 = vpop.permute.xlu0 %1760 }
 0x8af   :  { %3257 = vmatprep.subr.msk.bf16.mxu0 %vm3904_vm13, %v3255_v21  ;;  %3052 = vmatprep.mubr.msk.f32.mxu1 %vm527_vm10, %v1761_v24 }
 0x8b0   :  { %3260 = vmatpush3.bf16.msk.msra.mxu0 %vm3904_vm13, %v3255_v21  ;;  %3053 = vmatmul.mubr.msk.f32.vlgmr.msra.gmra.mrb[10].mxu1 %vm527_vm10, %v1763_v28 }
 0x8b1   :  { %3269 = vmatprep.subr.msk.bf16.mxu0 %vm3895_vm11, %v3267_v25 }
 0x8b2   :  { %v1852_v32 = vpop.permute.xlu0 %1851 }
 0x8b5   :  { %v3437_v29 = vpop.eup %3436 }
 0x8b6   :  { %v4088_v31 = vpop.eup %3438  ;;  %3045 = vmatprep.mubr.msk.f32.mxu0 %vm718_vm15, %v3437_v29  ;;  %v1570_v13 = vsel %vm718_vm15, %v3437_v29, 0.0 }
 0x8b7   :  { %3046 = vmatmul.mubr.msk.f32.vlgmr.msra.gmra.mrb[22].mxu0 %vm718_vm15, %v4088_v31 }
 0x8b8   :  { %3059 = vmatprep.mubr.msk.f32.mxu0 %vm527_vm10, %v1852_v32 }
 0x8b9   :  { %3272 = vmatpush3.bf16.xpose.msk.msra.mxu0 %vm3895_vm11, %v3267_v25 }
 0x8c0   :  { %3060 = vmatmul.mubr.msk.f32.vlgmr.msra.gmra.mrb[24].mxu0 %vm527_vm10, %v1854_v34 }
 0x977   :  { %v4097_v43 = vpop.f32.mrb[8].mxu1 }
 0x978   :  { %v4099_v44 = vpop.f32.mrb[9].mxu1 }
 0x983   :  { %v3054_v45 = vpop.f32.mrb[10].mxu1 }
 0x984   :  { %v1943_v47 = vmul.f32 0.35355338, %v3054_v45  ;;  %v1842_v48 = vpop.f32.mrb[11].mxu1 }
 0x985   :  { %v1942_v49 = vmul.f32 0.35355338, %v1842_v48 }
 0x986   :  { %v1947_v50 = vadd.f32 %v3929_v63, %v1943_v47  ;;  %v1163_v47 = vsel %vm722_vm14, %v4030_v6, 0.0 }
 0x987   :  { %v1946_v53 = vadd.f32 %v3929_v63, %v1942_v49 }
 0x988   :  { %v1953_v54 = vsel %vm722_vm14, %v1947_v50, -inf }
 0x989   :  { %1954 = vmax.xlane.f32.xlu1 %v1953_v54  ;;  %v1950_v46 = vsel %vm718_vm15, %v1946_v53, -inf }
 0x98a   :  { %1951 = vmax.xlane.f32.xlu0 %v1950_v46  ;;  %v4105_v57 = vpop.f32.mrb[22].mxu0 }
 0x98b   :  { %v4107_v33 = vpop.f32.mrb[23].mxu0 }
 0x993   :  { %v3061_v58 = vpop.f32.mrb[24].mxu0 }
 0x994   :  { %v1945_v39 = vmul.f32 0.35355338, %v3061_v58  ;;  %v1933_v61 = vpop.f32.mrb[25].mxu0 }
 0x995   :  { %v1944_v30 = vmul.f32 0.35355338, %v1933_v61 }
 0x996   :  { %v1949_v62 = vadd.f32 %v3942_v12, %v1945_v39  ;;  %v750_v39 = vsel %vm718_vm15, %v3968_v51, 0.0  ;;  %v744_v51 = vsel %vm718_vm15, %v3954_v36, 0.0 }
 0x997   :  { %v1948_v63 = vadd.f32 %v3942_v12, %v1944_v30  ;;  %v1160_v12 = vsel %vm718_vm15, %v4028_v3, 0.0  ;;  %v1573_v30 = vsel %vm722_vm14, %v4088_v31, 0.0 }
 0x998   :  { %v1959_v1 = vsel %vm722_vm14, %v1949_v62, -inf }
 0x999   :  { %1960 = vmax.xlane.f32.xlu0 %v1959_v1  ;;  %v1956_v2 = vsel %vm718_vm15, %v1948_v63, -inf }
 0x99a   :  { %3401 = vrot.lane.b32.xlu1 %v3874_v35, %s3513_s11  ;;  %v1157_v35 = vsel %vm722_vm14, %v4012_v40, 0.0 }
 0x99d   :  { %1957 = vmax.xlane.f32.xlu0 %v1956_v2 }
 0x9b3   :  { %3406 = vrot.lane.b32.xlu0 %v3888_v42, %s3513_s11  ;;  %v1567_v42 = vsel %vm722_vm14, %v4072_v0, 0.0 }
 0x9be   :  { %1155 = vadd.xlane.f32.xlu1 %v1154_v7 }
 0x9c2   :  { %1565 = vadd.xlane.f32.xlu1 %v1564_v9 }
 0x9d2   :  { %1161 = vadd.xlane.f32.xlu0 %v1160_v12 }
 0x9d6   :  { %1571 = vadd.xlane.f32.xlu0 %v1570_v13 }
 0x9da   :  { %1158 = vadd.xlane.f32.xlu0 %v1157_v35 }
 0x9de   :  { %1568 = vadd.xlane.f32.xlu0 %v1567_v42 }
 0xa16   :  { %v1955_v38 = vpop.xlane.xlu1 %1954 }
 0xa17   :  { %v1963_v14 = vsub.f32 %v1947_v50, %v1955_v38  ;;  %v1952_v15 = vpop.xlane.xlu0 %1951 }
 0xa18   :  { %v1962_v41 = vsub.f32 %v1946_v53, %v1952_v15 }
 0xa19   :  { %v1968_v16 = vmul.f32 1.442695, %v1963_v14 }
 0xa1a   :  { %v1966_v17 = vmul.f32 1.442695, %v1962_v41  ;;  %v3402_v18 = vpop.permute.xlu1 %3401  ;;  %v2241_v41 = vld [vmem:[%s4347_s16 + $0x10] sm:$0xff] }
 0xa1b   :  { %3440 = vpow2.f32 %v1968_v16  ;;  %v3404_v3 = vunpack.i.h.bf16 %v3402_v18  ;;  %v3403_v20 = vunpack.i.l.bf16 %v3402_v18  ;;  %v2242_v16 = vld [vmem:[%s4347_s16 + $0x18] sm:$0xff] }
 0xa1c   :  { %3442 = vpow2.f32 %v1966_v17 }
 0xa1d   :  { %v3273_v21 = vpack.c.bf16 %v3404_v3, %v3403_v20 }
 0xa1f   :  { %3275 = vmatprep.subr.msk.bf16.mxu1 %vm3904_vm13, %v3273_v21 }
 0xa20   :  { %3278 = vmatpush3.bf16.msk.msra.mxu1 %vm3904_vm13, %v3273_v21 }
 0xa21   :  { %3285 = vmatprep.subr.bf16.mxu1 %v3500_v59 }
 0xa25   :  { %v3441_v40 = vpop.eup %3440 }
 0xa26   :  { %v3443_v0 = vpop.eup %3442  ;;  %v1961_v24 = vpop.xlane.xlu0 %1960  ;;  %v1977_v25 = vsel %vm722_vm14, %v3441_v40, 0.0 }
 0xa27   :  { %v1965_v28 = vsub.f32 %v1949_v62, %v1961_v24  ;;  %3066 = vmatprep.mubr.msk.f32.mxu1 %vm718_vm15, %v3443_v0  ;;  %1978 = vadd.xlane.f32.xlu0 %v1977_v25  ;;  %v1974_v29 = vsel %vm718_vm15, %v3443_v0, 0.0  ;;  %v747_v62 = vsel %vm722_vm14, %v3956_v37, 0.0 }
 0xa28   :  { %3067 = vmatmul.mubr.msk.f32.vlgmr.msra.gmra.mrb[12].mxu1 %vm718_vm15, %v3441_v40  ;;  %1975 = vadd.xlane.f32.xlu1 %v1974_v29 }
 0xa29   :  { %v1972_v32 = vmul.f32 1.442695, %v1965_v28  ;;  %3084 = vmatprep.mubr.msk.f32.mxu1 %vm3501_vm9, %v3499_v8 }
 0xa2a   :  { %v1958_v34 = vpop.xlane.xlu0 %1957 }
 0xa2b   :  { %3444 = vpow2.f32 %v1972_v32  ;;  %v1964_v45 = vsub.f32 %v1948_v63, %v1958_v34 }
 0xa2c   :  { %1164 = vadd.xlane.f32.xlu1 %v1163_v47 }
 0xa2d   :  { %v1970_v48 = vmul.f32 1.442695, %v1964_v45 }
 0xa2e   :  { %v3407_v49 = vpop.permute.xlu0 %3406 }
 0xa2f   :  { %3446 = vpow2.f32 %v1970_v48  ;;  %v3409_v50 = vunpack.i.h.bf16 %v3407_v49  ;;  %v3408_v53 = vunpack.i.l.bf16 %v3407_v49 }
 0xa31   :  { %v3279_v54 = vpack.c.bf16 %v3409_v50, %v3408_v53 }
 0xa33   :  { %3281 = vmatprep.subr.msk.bf16.mxu0 %vm3904_vm13, %v3279_v54 }
 0xa34   :  { %3284 = vmatpush3.bf16.msk.msra.mxu0 %vm3904_vm13, %v3279_v54 }
 0xa35   :  { %v3445_v46 = vpop.eup %3444  ;;  %3291 = vmatprep.subr.bf16.mxu0 %v3500_v59 }
 0xa36   :  { %v1983_v58 = vsel %vm722_vm14, %v3445_v46, 0.0 }
 0xa37   :  { %1984 = vadd.xlane.f32.xlu0 %v1983_v58 }
 0xa39   :  { %v3447_v6 = vpop.eup %3446 }
 0xa3a   :  { %3073 = vmatprep.mubr.msk.f32.mxu0 %vm718_vm15, %v3447_v6  ;;  %v1980_v61 = vsel %vm718_vm15, %v3447_v6, 0.0 }
 0xa3b   :  { %751 = vadd.xlane.f32.xlu0 %v750_v39  ;;  %1981 = vadd.xlane.f32.xlu1 %v1980_v61 }
 0xa3c   :  { %3074 = vmatmul.mubr.msk.f32.vlgmr.msra.gmra.mrb[26].mxu0 %vm718_vm15, %v3445_v46 }
 0xa3d   :  { %3101 = vmatprep.mubr.msk.f32.mxu0 %vm3501_vm9, %v3499_v8 }
 0xa3f   :  { %754 = vadd.xlane.f32.xlu0 %v753_v60  ;;  %1574 = vadd.xlane.f32.xlu1 %v1573_v30 }
 0xa43   :  { %745 = vadd.xlane.f32.xlu1 %v744_v51 }
 0xa47   :  { %748 = vadd.xlane.f32.xlu1 %v747_v62 }
 0xa4b   :  { %v1156_v1 = vpop.xlane.xlu1 %1155 }
 0xa4c   :  { %3448 = vrcp.f32 %v1156_v1 }
 0xa4f   :  { %v1566_v63 = vpop.xlane.xlu1 %1565 }
 0xa50   :  { %3450 = vrcp.f32 %v1566_v63 }
 0xa56   :  { %v3449_v2 = vpop.eup %3448 }
 0xa57   :  { %v1346_v52 = vmul.f32 %v3449_v2, %v4042_v11 }
 0xa59   :  { %2174 = vrot.lane.b32.xlu1 %v1346_v52, %s3514_s28 }
 0xa5a   :  { %v3451_v31 = vpop.eup %3450 }
 0xa5b   :  { %v1756_v7 = vmul.f32 %v3451_v31, %v4099_v44 }
 0xa5d   :  { %2190 = vrot.lane.b32.xlu1 %v1756_v7, %s3515_s3 }
 0xa5f   :  { %v1162_v36 = vpop.xlane.xlu0 %1161 }
 0xa60   :  { %3452 = vrcp.f32 %v1162_v36 }
 0xa63   :  { %v1572_v37 = vpop.xlane.xlu0 %1571 }
 0xa64   :  { %3454 = vrcp.f32 %v1572_v37 }
 0xa67   :  { %v1159_v9 = vpop.xlane.xlu0 %1158 }
 0xa68   :  { %3456 = vrcp.f32 %v1159_v9 }
 0xa6a   :  { %v3453_v12 = vpop.eup %3452 }
 0xa6b   :  { %v1569_v13 = vpop.xlane.xlu0 %1568  ;;  %v1348_v35 = vmul.f32 %v3453_v12, %v4050_v23  ;;  %v2239_v23 = vld [vmem:[%s4347_s16] sm:$0xff] }
 0xa6c   :  { %3458 = vrcp.f32 %v1569_v13 }
 0xa6d   :  { %2178 = vrot.lane.b32.xlu0 %v1348_v35, %s3514_s28 }
 0xa6e   :  { %v3455_v11 = vpop.eup %3454 }
 0xa6f   :  { %v1758_v42 = vmul.f32 %v3455_v11, %v4107_v33  ;;  %v2240_v33 = vld [vmem:[%s4347_s16 + $0x8] sm:$0xff]  ;;  %s3516_s16 = smov 24  }
 0xa71   :  { %2194 = vrot.lane.b32.xlu1 %v1758_v42, %s3515_s3 }
 0xa72   :  { %v3457_v44 = vpop.eup %3456 }
 0xa73   :  { %v1347_v38 = vmul.f32 %v3457_v44, %v4040_v10  ;;  %v3286_v10 = vpack.c.bf16 %v2240_v33, %v2239_v23 }
 0xa75   :  { %2176 = vrot.lane.b32.xlu1 %v1347_v38, %s3514_s28  ;;  %3287 = vmatpush3.bf16.msra.mxu1 %v3286_v10 }
 0xa76   :  { %v3459_v14 = vpop.eup %3458  ;;  %3288 = vmatprep.subr.bf16.mxu1 %v3500_v59 }
 0xa77   :  { %v1757_v15 = vmul.f32 %v3459_v14, %v4097_v43  ;;  %v3289_v43 = vpack.c.bf16 %v2242_v16, %v2241_v41 }
 0xa79   :  { %2192 = vrot.lane.b32.xlu1 %v1757_v15, %s3515_s3  ;;  %3290 = vmatpush3.bf16.msra.mxu1 %v3289_v43 }
 0xa7a   :  { %3297 = vmatprep.subr.bf16.mxu1 %v3500_v59 }
 0xab4   :  { %v1979_v18 = vpop.xlane.xlu0 %1978 }
 0xab5   :  { %v1976_v17 = vpop.xlane.xlu1 %1975  ;;  %3460 = vrcp.f32 %v1979_v18 }
 0xab6   :  { %3462 = vrcp.f32 %v1976_v17 }
 0xab9   :  { %v1165_v3 = vpop.xlane.xlu1 %1164 }
 0xaba   :  { %3464 = vrcp.f32 %v1165_v3 }
 0xabf   :  { %v3461_v20 = vpop.eup %3460 }
 0xac0   :  { %v3463_v40 = vpop.eup %3462 }
 0xac4   :  { %v3465_v28 = vpop.eup %3464  ;;  %v1985_v34 = vpop.xlane.xlu0 %1984 }
 0xac5   :  { %v1349_v32 = vmul.f32 %v3465_v28, %v4048_v22  ;;  %3466 = vrcp.f32 %v1985_v34 }
 0xac8   :  { %v1982_v29 = vpop.xlane.xlu1 %1981  ;;  %v752_v6 = vpop.xlane.xlu0 %751 }
 0xac9   :  { %3468 = vrcp.f32 %v1982_v29 }
 0xacc   :  { %v1575_v45 = vpop.xlane.xlu1 %1574  ;;  %v755_v60 = vpop.xlane.xlu0 %754 }
 0xacd   :  { %3470 = vrcp.f32 %v1575_v45 }
 0xacf   :  { %v3467_v47 = vpop.eup %3466 }
 0xad0   :  { %v746_v22 = vpop.xlane.xlu1 %745 }
 0xad1   :  { %3472 = vrcp.f32 %v746_v22 }
 0xad2   :  { %3474 = vrcp.f32 %v752_v6 }
 0xad3   :  { %v3469_v49 = vpop.eup %3468 }
 0xad4   :  { %v749_v39 = vpop.xlane.xlu1 %748 }
 0xad5   :  { %3476 = vrcp.f32 %v749_v39 }
 0xad6   :  { %3478 = vrcp.f32 %v755_v60 }
 0xad7   :  { %v3471_v46 = vpop.eup %3470 }
 0xad8   :  { %v1759_v58 = vmul.f32 %v3471_v46, %v4105_v57  ;;  %v2175_v51 = vpop.permute.xlu1 %2174 }
 0xadb   :  { %v3473_v61 = vpop.eup %3472 }
 0xadc   :  { %v936_v30 = vmul.f32 %v3473_v61, %v3982_v56  ;;  %v2191_v63 = vpop.permute.xlu1 %2190  ;;  %v3475_v7 = vpop.eup %3474 }
 0xadd   :  { %v938_v12 = vmul.f32 %v3475_v7, %v3990_v5 }
 0xade   :  { %v2218_v1 = vsel %vm527_vm10, %v936_v30, %v2175_v51 }
 0xadf   :  { %v2179_v62 = vpop.permute.xlu0 %2178  ;;  %v2223_v2 = vsel %vm2222_vm0, %v2218_v1, %v2191_v63  ;;  %v3477_v36 = vpop.eup %3476  ;;  %v2400_v1 = vld [vmem:[%s4349_s20] sm:$0xff]  ;;  %v2401_v63 = vld [vmem:[%s4349_s20 + $0x8] sm:$0xff] }
 0xae0   :  { %v3479_v13 = vpop.eup %3478  ;;  %v2220_v35 = vsel %vm527_vm10, %v938_v12, %v2179_v62  ;;  %v937_v11 = vmul.f32 %v3477_v36, %v3980_v55  ;;  %v2775_v12 = vld [vmem:[%s4350_s18] ss:$0 sm:$0xff] }
 0xae1   :  { %v939_v33 = vmul.f32 %v3479_v13, %v3988_v4 }
 0xae3   :  { %v2195_v31 = vpop.permute.xlu1 %2194 }
 0xae4   :  { %v2225_v42 = vsel %vm2222_vm0, %v2220_v35, %v2195_v31  ;;  %v2403_v31 = vld [vmem:[%s4349_s20 + $0x18] sm:$0xff]  ;;  %v2776_v35 = vld [vmem:[%s4351_s19] ss:$0 sm:$0xff] }
 0xae7   :  { %v2177_v56 = vpop.permute.xlu1 %2176 }
 0xae8   :  { %v2219_v14 = vsel %vm527_vm10, %v937_v11, %v2177_v56 }
 0xaeb   :  { %v2193_v37 = vpop.permute.xlu1 %2192 }
 0xaec   :  { %v2224_v23 = vsel %vm2222_vm0, %v2219_v14, %v2193_v37 }
 0xafb   :  { %v3068_v21 = vpop.f32.mrb[12].mxu1 }
 0xafc   :  { %v2167_v0 = vmul.f32 %v3461_v20, %v3068_v21  ;;  %v2065_v24 = vpop.f32.mrb[13].mxu1  ;;  %v2771_v20 = vld [vmem:[%s4348_s17] ss:$0 sm:$0xff] }
 0xafd   :  { %v2166_v25 = vmul.f32 %v3463_v40, %v2065_v24 }
 0xafe   :  { %2208 = vrot.lane.b32.xlu1 %v2167_v0, %s3516_s16 }
 0xaff   :  { %2206 = vrot.lane.b32.xlu0 %v2166_v25, %s3516_s16 }
 0xb03   :  { %2180 = vrot.lane.b32.xlu0 %v1349_v32, %s3514_s28 }
 0xb0f   :  { %v3075_v48 = vpop.f32.mrb[26].mxu0 }
 0xb10   :  { %v2169_v50 = vmul.f32 %v3467_v47, %v3075_v48  ;;  %v2153_v53 = vpop.f32.mrb[27].mxu0 }
 0xb11   :  { %v2168_v54 = vmul.f32 %v3469_v49, %v2153_v53 }
 0xb12   :  { %2212 = vrot.lane.b32.xlu1 %v2169_v50, %s3516_s16 }
 0xb13   :  { %2210 = vrot.lane.b32.xlu0 %v2168_v54, %s3516_s16 }
 0xb17   :  { %2196 = vrot.lane.b32.xlu0 %v1759_v58, %s3515_s3 }
 0xb70   :  { %v2209_v44 = vpop.permute.xlu1 %2208 }
 0xb71   :  { %v2207_v57 = vpop.permute.xlu0 %2206  ;;  %v2229_v5 = vsel %vm2227_vm1, %v2224_v23, %v2209_v44 }
 0xb72   :  { %v2228_v52 = vsel %vm2227_vm1, %v2223_v2, %v2207_v57  ;;  %v3292_v57 = vpack.c.bf16 %v2401_v63, %v2400_v1 }
 0xb73   :  { %3085 = vmatmul.mubr.msk.f32.vlgmr.msra.gmra.mrb[14].mxu1 %vm219_vm8, %v2228_v52  ;;  %v2402_v52 = vld [vmem:[%s4349_s20 + $0x10] sm:$0xff] }
 0xb74   :  { %3087 = vmatprep.mubr.msk.f32.mxu1 %vm3501_vm9, %v3499_v8  ;;  %3293 = vmatpush3.bf16.msra.mxu0 %v3292_v57  ;;  %v3295_v56 = vpack.c.bf16 %v2403_v31, %v2402_v52 }
 0xb75   :  { %v2181_v9 = vpop.permute.xlu0 %2180  ;;  %3294 = vmatprep.subr.bf16.mxu0 %v3500_v59 }
 0xb76   :  { %v2221_v10 = vsel %vm527_vm10, %v939_v33, %v2181_v9 }
 0xb78   :  { %3296 = vmatpush3.bf16.msra.mxu0 %v3295_v56 }
 0xb84   :  { %v2213_v43 = vpop.permute.xlu1 %2212 }
 0xb85   :  { %v2211_v38 = vpop.permute.xlu0 %2210 }
 0xb86   :  { %v2230_v15 = vsel %vm2227_vm1, %v2225_v42, %v2211_v38 }
 0xb87   :  { %v2234_v41 = vrot.slane %v2230_v15, 4 }
 0xb89   :  { %v2197_v16 = vpop.permute.xlu0 %2196  ;;  %v2238_v55 = vsel %vm378_vm7, %v2229_v5, %v2234_v41 }
 0xb8a   :  { %v2226_v17 = vsel %vm2222_vm0, %v2221_v10, %v2197_v16  ;;  %3088 = vmatmul.mubr.msk.f32.gmra.mrb[16].mxu1 %vm219_vm8, %v2238_v55 }
 0xb8b   :  { %v2231_v18 = vsel %vm2227_vm1, %v2226_v17, %v2213_v43  ;;  %3090 = vmatprep.mubr.msk.f32.mxu1 %vm3501_vm9, %v3499_v8 }
 0xb8c   :  { %v2235_v3 = vrot.slane %v2231_v18, 4 }
 0xb8e   :  { %v2236_v4 = vsel %vm378_vm7, %v2234_v41, %v2235_v3  ;;  %v2527_v3 = vld [vmem:[%s4352_s22] sm:$0xff] }
 0xb8f   :  { %3091 = vmatmul.mubr.msk.f32.gmra.mrb[18].mxu1 %vm219_vm8, %v2236_v4  ;;  %v2528_v4 = vld [vmem:[%s4352_s22 + $0x8] sm:$0xff] }
 0xb90   :  { %3126 = vmatprep.mubr.msk.f32.mxu1 %vm3501_vm9, %v3499_v8 }
 0xc46   :  { %v2324_v21 = vpop.f32.mrb[14].mxu1 }
 0xc47   :  { %v2325_v40 = vadd.f32 %v2771_v20, %v2324_v21  ;;  %v3086_v0 = vpop.f32.mrb[15].mxu1  ;;  %v2529_v21 = vld [vmem:[%s4352_s22 + $0x10] sm:$0xff] }
 0xc49   :  { %v2338_v24 = vadd.f32 %v2325_v40, %v3842_v19  ;;  %v2530_v40 = vld [vmem:[%s4352_s22 + $0x18] sm:$0xff] }
 0xc4a   :  { %v3301_v0 = vpack.c.bf16 %v2530_v40, %v2529_v21 }
 0xc4b   :  { %v2343_v25 = vsel %vm219_vm8, %v2338_v24, 0.0 }
 0xc4c   :  { %2344 = vadd.xlane.f32.xlu0 %v2343_v25  ;;  %v2532_v25 = vld [vmem:[%s4352_s22 + $0x28] sm:$0xff] }
 0xc5d   :  { %v2329_v28 = vpop.f32.mrb[16].mxu1 }
 0xc5e   :  { %v2330_v29 = vadd.f32 %v2771_v20, %v2329_v28  ;;  %v3089_v32 = vpop.f32.mrb[17].mxu1 }
 0xc5f   :  { %v2534_v32 = vld [vmem:[%s4352_s22 + $0x38] sm:$0xff] }
 0xc60   :  { %v2339_v34 = vadd.f32 %v2330_v29, %v3852_v26  ;;  %v2533_v29 = vld [vmem:[%s4352_s22 + $0x30] sm:$0xff] }
 0xc62   :  { %v2334_v45 = vpop.f32.mrb[18].mxu1  ;;  %v2346_v47 = vsel %vm219_vm8, %v2339_v34, 0.0 }
 0xc63   :  { %v2335_v48 = vadd.f32 %v2771_v20, %v2334_v45  ;;  %2347 = vadd.xlane.f32.xlu1 %v2346_v47  ;;  %v3092_v49 = vpop.f32.mrb[19].mxu1  ;;  %v3298_v20 = vpack.c.bf16 %v2528_v4, %v2527_v3  ;;  %v2777_v45 = vld [vmem:[%s4353_s21] ss:$0 sm:$0xff] }
 0xc65   :  { %v2340_v50 = vadd.f32 %v2335_v48, %v3859_v27  ;;  %3299 = vmatpush3.bf16.msra.mxu1 %v3298_v20 }
 0xc66   :  { %3300 = vmatprep.subr.bf16.mxu1 %v3500_v59 }
 0xc67   :  { %v2349_v53 = vsel %vm219_vm8, %v2340_v50, 0.0 }
 0xc68   :  { %2350 = vadd.xlane.f32.xlu0 %v2349_v53 }
 0xc69   :  { %3302 = vmatpush3.bf16.msra.mxu1 %v3301_v0 }
 0xc6a   :  { %3303 = vmatprep.subr.bf16.mxu1 %v3500_v59 }
 0xcd9   :  { %v2345_v19 = vpop.xlane.xlu0 %2344 }
 0xcda   :  { %v2352_v54 = vmul.f32 0.03125, %v2345_v19 }
 0xcdc   :  { %v2355_v46 = vsub.f32 %v2338_v24, %v2352_v54  ;;  %v2531_v24 = vld [vmem:[%s4352_s22 + $0x20] sm:$0xff] }
 0xcdd   :  { %v3304_v28 = vpack.c.bf16 %v2532_v25, %v2531_v24 }
 0xcde   :  { %v2358_v58 = vmul.f32 %v2355_v46, %v2355_v46 }
 0xcdf   :  { %3305 = vmatpush3.bf16.msra.mxu1 %v3304_v28 }
 0xce0   :  { %v2361_v22 = vsel %vm219_vm8, %v2358_v58, 0.0  ;;  %3306 = vmatprep.subr.bf16.mxu1 %v3500_v59 }
 0xce1   :  { %2362 = vadd.xlane.f32.xlu0 %v2361_v22 }
 0xcf0   :  { %v2348_v6 = vpop.xlane.xlu1 %2347 }
 0xcf1   :  { %v2353_v26 = vmul.f32 0.03125, %v2348_v6 }
 0xcf3   :  { %v2356_v39 = vsub.f32 %v2339_v34, %v2353_v26  ;;  %v3307_v34 = vpack.c.bf16 %v2534_v32, %v2533_v29 }
 0xcf5   :  { %v2351_v61 = vpop.xlane.xlu0 %2350  ;;  %v2359_v60 = vmul.f32 %v2356_v39, %v2356_v39  ;;  %3308 = vmatpush3.bf16.msra.mxu1 %v3307_v34 }
 0xcf6   :  { %v2354_v30 = vmul.f32 0.03125, %v2351_v61 }
 0xcf7   :  { %v2364_v51 = vsel %vm219_vm8, %v2359_v60, 0.0 }
 0xcf8   :  { %v2357_v62 = vsub.f32 %v2340_v50, %v2354_v30  ;;  %2365 = vadd.xlane.f32.xlu1 %v2364_v51 }
 0xcfa   :  { %v2360_v27 = vmul.f32 %v2357_v62, %v2357_v62 }
 0xcfc   :  { %v2367_v2 = vsel %vm219_vm8, %v2360_v27, 0.0 }
 0xcfd   :  { %2368 = vadd.xlane.f32.xlu0 %v2367_v2 }
 0xd6e   :  { %v2363_v7 = vpop.xlane.xlu0 %2362 }
 0xd6f   :  { %v2370_v36 = vmul.f32 0.03125, %v2363_v7 }
 0xd71   :  { %v2373_v37 = vadd.f32 1e-05, %v2370_v36 }
 0xd73   :  { %3480 = vrsqrt.f32 %v2373_v37 }
 0xd7d   :  { %v3481_v9 = vpop.eup %3480 }
 0xd7e   :  { %v2379_v13 = vmul.f32 %v3481_v9, %v2355_v46 }
 0xd80   :  { %v2388_v11 = vmul.f32 %v2775_v12, %v2379_v13 }
 0xd82   :  { %v4248_v42 = vadd.f32 %v2776_v35, %v2388_v11 }
 0xd84   :  { %3102 = vmatmul.mubr.msk.f32.vlgmr.msra.gmra.mrb[28].mxu0 %vm219_vm8, %v4248_v42 }
 0xd85   :  { %v2366_v44 = vpop.xlane.xlu1 %2365  ;;  %3104 = vmatprep.mubr.msk.f32.mxu0 %vm3501_vm9, %v3499_v8 }
 0xd86   :  { %v2371_v38 = vmul.f32 0.03125, %v2366_v44 }
 0xd88   :  { %v2374_v14 = vadd.f32 1e-05, %v2371_v38  ;;  %v2781_v38 = vld [vmem:[%s4354_s23] ss:$0 sm:$0xff] }
 0xd8a   :  { %3482 = vrsqrt.f32 %v2374_v14  ;;  %v2369_v15 = vpop.xlane.xlu0 %2368 }
 0xd8b   :  { %v2372_v23 = vmul.f32 0.03125, %v2369_v15 }
 0xd8d   :  { %v2375_v33 = vadd.f32 1e-05, %v2372_v23 }
 0xd8f   :  { %3484 = vrsqrt.f32 %v2375_v33 }
 0xd94   :  { %v3483_v41 = vpop.eup %3482 }
 0xd95   :  { %v2380_v5 = vmul.f32 %v3483_v41, %v2356_v39 }
 0xd97   :  { %v2389_v10 = vmul.f32 %v2775_v12, %v2380_v5 }
 0xd99   :  { %v3485_v16 = vpop.eup %3484  ;;  %v4254_v55 = vadd.f32 %v2776_v35, %v2389_v10 }
 0xd9a   :  { %v2381_v43 = vmul.f32 %v3485_v16, %v2357_v62 }
 0xd9b   :  { %3105 = vmatmul.mubr.msk.f32.gmra.mrb[30].mxu0 %vm219_vm8, %v4254_v55 }
 0xd9c   :  { %3107 = vmatprep.mubr.msk.f32.mxu0 %vm3501_vm9, %v3499_v8  ;;  %v2390_v17 = vmul.f32 %v2775_v12, %v2381_v43 }
 0xd9e   :  { %v4260_v18 = vadd.f32 %v2776_v35, %v2390_v17 }
 0xda0   :  { %3108 = vmatmul.mubr.msk.f32.gmra.mrb[32].mxu0 %vm219_vm8, %v4260_v18 }
 0xe57   :  { %v2486_v47 = vpop.f32.mrb[28].mxu0 }
 0xe58   :  { %v2487_v48 = vadd.f32 %v2777_v45, %v2486_v47  ;;  %v3103_v49 = vpop.f32.mrb[29].mxu0 }
 0xe5a   :  { %v2500_v50 = vmul.f32 %v2487_v48, %v2487_v48 }
 0xe5c   :  { %v2503_v53 = vmul.f32 %v2500_v50, %v2487_v48 }
 0xe5e   :  { %v2506_v59 = vmul.f32 0.044715, %v2503_v53 }
 0xe60   :  { %v2509_v19 = vadd.f32 %v2506_v59, %v2487_v48 }
 0xe62   :  { %v2512_v54 = vmul.f32 0.7978846, %v2509_v19 }
 0xe64   :  { %3486 = vtanh.f32 %v2512_v54  ;;  %v2785_v54 = vld [vmem:[%s4355_s24] ss:$0 sm:$0xff] }
 0xe6e   :  { %v3487_v46 = vpop.eup %3486  ;;  %v2491_v58 = vpop.f32.mrb[30].mxu0 }
 0xe6f   :  { %v2518_v22 = vadd.f32 1.0, %v3487_v46  ;;  %v2492_v6 = vadd.f32 %v2777_v45, %v2491_v58  ;;  %v3106_v26 = vpop.f32.mrb[31].mxu0  ;;  %v2786_v58 = vld [vmem:[%s4356_s25] ss:$0 sm:$0xff] }
 0xe71   :  { %v2521_v39 = vmul.f32 0.5, %v2518_v22  ;;  %v2501_v61 = vmul.f32 %v2492_v6, %v2492_v6 }
 0xe73   :  { %v2524_v60 = vmul.f32 %v2521_v39, %v2487_v48  ;;  %v2504_v30 = vmul.f32 %v2501_v61, %v2492_v6  ;;  %v2496_v51 = vpop.f32.mrb[32].mxu0 }
 0xe74   :  { %v2497_v62 = vadd.f32 %v2777_v45, %v2496_v51  ;;  %v3109_v27 = vpop.f32.mrb[33].mxu0 }
 0xe75   :  { %v2507_v1 = vmul.f32 0.044715, %v2504_v30  ;;  %3127 = vmatmul.mubr.msk.f32.vlgmr.msra.gmra.mrb[20].mxu1 %vm132_vm2, %v2524_v60 }
 0xe76   :  { %v2502_v63 = vmul.f32 %v2497_v62, %v2497_v62  ;;  %3129 = vmatprep.mubr.msk.f32.mxu1 %vm3501_vm9, %v3499_v8 }
 0xe77   :  { %v2510_v2 = vadd.f32 %v2507_v1, %v2492_v6 }
 0xe78   :  { %v2505_v57 = vmul.f32 %v2502_v63, %v2497_v62 }
 0xe79   :  { %v2513_v52 = vmul.f32 0.7978846, %v2510_v2 }
 0xe7a   :  { %v2508_v31 = vmul.f32 0.044715, %v2505_v57 }
 0xe7b   :  { %3488 = vtanh.f32 %v2513_v52 }
 0xe7c   :  { %v2511_v56 = vadd.f32 %v2508_v31, %v2497_v62 }
 0xe7e   :  { %v2514_v7 = vmul.f32 0.7978846, %v2511_v56 }
 0xe80   :  { %3490 = vtanh.f32 %v2514_v7 }
 0xe85   :  { %v3489_v36 = vpop.eup %3488 }
 0xe86   :  { %v2519_v37 = vadd.f32 1.0, %v3489_v36 }
 0xe88   :  { %v2522_v9 = vmul.f32 0.5, %v2519_v37 }
 0xe8a   :  { %v3491_v12 = vpop.eup %3490  ;;  %v2525_v13 = vmul.f32 %v2522_v9, %v2492_v6 }
 0xe8b   :  { %v2520_v35 = vadd.f32 1.0, %v3491_v12 }
 0xe8c   :  { %3130 = vmatmul.mubr.msk.f32.gmra.mrb[22].mxu1 %vm132_vm2, %v2525_v13 }
 0xe8d   :  { %3132 = vmatprep.mubr.msk.f32.mxu1 %vm3501_vm9, %v3499_v8  ;;  %v2523_v11 = vmul.f32 0.5, %v2520_v35 }
 0xe8f   :  { %v2526_v44 = vmul.f32 %v2523_v11, %v2497_v62 }
 0xe91   :  { %3133 = vmatmul.mubr.msk.f32.gmra.mrb[24].mxu1 %vm132_vm2, %v2526_v44 }
 0xf48   :  { %v2617_v14 = vpop.f32.mrb[20].mxu1 }
 0xf49   :  { %v2618_v15 = vadd.f32 %v2781_v38, %v2617_v14  ;;  %v3128_v23 = vpop.f32.mrb[21].mxu1 }
 0xf4b   :  { %v2631_v33 = vadd.f32 %v2618_v15, %v4248_v42 }
 0xf4d   :  { %v2636_v41 = vsel %vm219_vm8, %v2631_v33, 0.0 }
 0xf4e   :  { %2637 = vadd.xlane.f32.xlu1 %v2636_v41 }
 0xf5f   :  { %v2622_v5 = vpop.f32.mrb[22].mxu1 }
 0xf60   :  { %v2623_v10 = vadd.f32 %v2781_v38, %v2622_v5  ;;  %v3131_v16 = vpop.f32.mrb[23].mxu1 }
 0xf62   :  { %v2632_v8 = vadd.f32 %v2623_v10, %v4254_v55 }
 0xf64   :  { %v2627_v43 = vpop.f32.mrb[24].mxu1  ;;  %v2639_v17 = vsel %vm219_vm8, %v2632_v8, 0.0 }
 0xf65   :  { %v2628_v3 = vadd.f32 %v2781_v38, %v2627_v43  ;;  %2640 = vadd.xlane.f32.xlu0 %v2639_v17  ;;  %v3134_v4 = vpop.f32.mrb[25].mxu1 }
 0xf67   :  { %v2633_v20 = vadd.f32 %v2628_v3, %v4260_v18 }
 0xf69   :  { %v2642_v21 = vsel %vm219_vm8, %v2633_v20, 0.0 }
 0xf6a   :  { %2643 = vadd.xlane.f32.xlu1 %v2642_v21 }
 0xfdb   :  { %v2638_v42 = vpop.xlane.xlu1 %2637 }
 0xfdc   :  { %v2645_v40 = vmul.f32 0.03125, %v2638_v42 }
 0xfde   :  { %v2648_v0 = vsub.f32 %v2631_v33, %v2645_v40 }
 0xfe0   :  { %v2651_v24 = vmul.f32 %v2648_v0, %v2648_v0 }
 0xfe2   :  { %v2654_v25 = vsel %vm219_vm8, %v2651_v24, 0.0 }
 0xfe3   :  { %2655 = vadd.xlane.f32.xlu0 %v2654_v25 }
 0xff2   :  { %v2641_v28 = vpop.xlane.xlu0 %2640 }
 0xff3   :  { %v2646_v55 = vmul.f32 0.03125, %v2641_v28 }
 0xff5   :  { %v2649_v29 = vsub.f32 %v2632_v8, %v2646_v55 }
 0xff7   :  { %v2644_v32 = vpop.xlane.xlu1 %2643  ;;  %v2652_v34 = vmul.f32 %v2649_v29, %v2649_v29 }
 0xff8   :  { %v2647_v45 = vmul.f32 0.03125, %v2644_v32 }
 0xff9   :  { %v2657_v47 = vsel %vm219_vm8, %v2652_v34, 0.0 }
 0xffa   :  { %v2650_v48 = vsub.f32 %v2633_v20, %v2647_v45  ;;  %2658 = vadd.xlane.f32.xlu1 %v2657_v47 }
 0xffc   :  { %v2653_v18 = vmul.f32 %v2650_v48, %v2650_v48 }
 0xffe   :  { %v2660_v49 = vsel %vm219_vm8, %v2653_v18, 0.0 }
 0xfff   :  { %2661 = vadd.xlane.f32.xlu0 %v2660_v49 }
0x1070   :  { %v2656_v50 = vpop.xlane.xlu0 %2655 }
0x1071   :  { %v2663_v53 = vmul.f32 0.03125, %v2656_v50 }
0x1073   :  { %v2666_v59 = vadd.f32 1e-05, %v2663_v53 }
0x1075   :  { %3492 = vrsqrt.f32 %v2666_v59 }
0x107f   :  { %v3493_v19 = vpop.eup %3492 }
0x1080   :  { %v2672_v46 = vmul.f32 %v3493_v19, %v2648_v0 }
0x1082   :  { %v2681_v22 = vmul.f32 %v2785_v54, %v2672_v46 }
0x1084   :  { %v2690_v6 = vadd.f32 %v2786_v58, %v2681_v22 }
0x1086   :  { %2693 = vst.msk [vmem:[%s4357_s26] sm:$0xff] %vm219_vm8, %v2690_v6 }
0x1087   :  { %v2659_v26 = vpop.xlane.xlu1 %2658 }
0x1088   :  { %v2664_v39 = vmul.f32 0.03125, %v2659_v26 }
0x108a   :  { %v2667_v61 = vadd.f32 1e-05, %v2664_v39 }
0x108c   :  { %3494 = vrsqrt.f32 %v2667_v61  ;;  %v2662_v60 = vpop.xlane.xlu0 %2661 }
0x108d   :  { %v2665_v30 = vmul.f32 0.03125, %v2662_v60 }
0x108f   :  { %v2668_v51 = vadd.f32 1e-05, %v2665_v30 }
0x1091   :  { %3496 = vrsqrt.f32 %v2668_v51 }
0x1096   :  { %v3495_v62 = vpop.eup %3494 }
0x1097   :  { %v2673_v27 = vmul.f32 %v3495_v62, %v2649_v29 }
0x1099   :  { %v2682_v1 = vmul.f32 %v2785_v54, %v2673_v27 }
0x109b   :  { %v3497_v63 = vpop.eup %3496  ;;  %v2691_v2 = vadd.f32 %v2786_v58, %v2682_v1 }
0x109c   :  { %v2674_v57 = vmul.f32 %v3497_v63, %v2650_v48 }
0x109d   :  { %2694 = vst.msk [vmem:[%s4357_s26 + $0x8] sm:$0xff] %vm219_vm8, %v2691_v2 }
0x109e   :  { %v2683_v52 = vmul.f32 %v2785_v54, %v2674_v57 }
0x10a0   :  { %v2692_v31 = vadd.f32 %v2786_v58, %v2683_v52 }
0x10a2   :  { %2695 = vst.msk [vmem:[%s4357_s26 + $0x10] sm:$0xff] %vm219_vm8, %v2692_v31 }

</bundles_post_ra>
